<compile_context>
chip_gen: v7x
topology: tpu7x:2x2x1
jax: 0.10.0
libtpu: 0.0.40
codegen_flags: <defaults>
</compile_context>

<pallas_src>
import functools
import math

import jax
import jax.numpy as jnp
from jax import lax
from jax.experimental import pallas as pl
from jax.experimental.pallas import tpu as pltpu


# --------------------------------------------------------------------------
# Kernel A: fused q/k/v input projection, tiled over the sequence.
# --------------------------------------------------------------------------
def _qkv_proj_kernel(x_ref, w_ref, b_ref, q_ref, k_ref, v_ref,
                     *, nhead, head_dim, compute_dtype):
    x = x_ref[...].astype(compute_dtype)                     # (TS, D)
    # Single wide matmul against the fused (D, 3*H*hd) weight: one vmatmul
    # stream per sequence tile instead of 3*H narrow ones.
    proj = jnp.dot(x, w_ref[...], preferred_element_type=jnp.float32) + b_ref[...]
    d_model = nhead * head_dim
    # Head-major writes by leading-dim index; lane slices below start at
    # multiples of head_dim (a multiple of 128) -> tile-aligned, no relayout.
    for h in range(nhead):
        lo = h * head_dim
        q_ref[h] = proj[:, lo:lo + head_dim].astype(q_ref.dtype)
        k_ref[h] = proj[:, d_model + lo:d_model + lo + head_dim].astype(k_ref.dtype)
        v_ref[h] = proj[:, 2 * d_model + lo:2 * d_model + lo + head_dim].astype(v_ref.dtype)


# --------------------------------------------------------------------------
# Kernel B: causal flash attention + out_proj + residual + LayerNorm2 + FFN.
# --------------------------------------------------------------------------
def _attn_ffn_kernel(x_ref, q_ref, k_ref, v_ref,
                     wo_ref, bo_ref, g2_ref, beta2_ref,
                     w1_ref, b1_ref, w2_ref, b2_ref,
                     out_ref,
                     m_scr, l_scr, acc_scr,
                     *, nhead, head_dim, q_tile, kv_tile, eps, compute_dtype):
    i = pl.program_id(0)          # query tile (parallel)
    j = pl.program_id(1)          # kv tile    (arbitrary / reduction)

    # Last kv tile that intersects the causal region of query tile i.
    last_kv = ((i + 1) * q_tile - 1) // kv_tile

    @pl.when(j == 0)
    def _init():
        m_scr[...] = jnp.full(m_scr.shape, -jnp.inf, dtype=m_scr.dtype)
        l_scr[...] = jnp.zeros(l_scr.shape, dtype=l_scr.dtype)
        acc_scr[...] = jnp.zeros(acc_scr.shape, dtype=acc_scr.dtype)

    def scores():
        # 1/sqrt(head_dim) already folded into wq -> no per-step scaling here.
        return jnp.einsum("hqd,hkd->hqk", q_ref[...], k_ref[...],
                          preferred_element_type=jnp.float32)

    def softmax_update(s):
        # Online softmax update, all f32.
        m_prev = m_scr[...]
        m_new = jnp.maximum(m_prev, jnp.max(s, axis=-1, keepdims=True))
        alpha = jnp.exp(m_prev - m_new)
        p = jnp.exp(s - m_new)
        l_scr[...] = alpha * l_scr[...] + jnp.sum(p, axis=-1, keepdims=True)
        acc_scr[...] = alpha * acc_scr[...] + jnp.einsum(
            "hqk,hkd->hqd", p.astype(compute_dtype), v_ref[...],
            preferred_element_type=jnp.float32)
        m_scr[...] = m_new

    below_diag = (j + 1) * kv_tile <= i * q_tile                     # no mask needed
    on_diag = jnp.logical_and((j + 1) * kv_tile > i * q_tile,
                              j * kv_tile < (i + 1) * q_tile)        # needs mask
    # Strictly-upper tiles (j > last_kv) fall through every branch: compute is
    # skipped and the clamped k/v index maps elide their DMAs.
    # TODO(synk): for long S, replace the rectangular (i, j) grid with a per-i
    # dynamic-length kv loop (emit_pipeline / manual double-buffered DMA) so the
    # ~S^2/(2*TQ*TK) dead steps stop paying per-step pipeline overhead.

    @pl.when(below_diag)
    def _acc_unmasked():
        softmax_update(scores())

    @pl.when(on_diag)
    def _acc_diagonal():
        s = scores()
        # 2-D iota mask, broadcast over heads, built ONLY on the diagonal tile.
        row = i * q_tile + lax.broadcasted_iota(jnp.int32, (q_tile, kv_tile), 0)
        col = j * kv_tile + lax.broadcasted_iota(jnp.int32, (q_tile, kv_tile), 1)
        s = jnp.where((row >= col)[None, :, :], s, jnp.float32(-1e30))
        softmax_update(s)

    # Finalize right after the diagonal tile (not at j == n_kv-1), so the heavy
    # out_proj/LN/FFN epilogue overlaps the remaining dead grid steps.
    @pl.when(j == last_kv)
    def _finalize():
        xt = x_ref[...].astype(jnp.float32)                           # (TQ, D)
        # Exact normalization (runs once per query tile -> cost negligible).
        attn = (acc_scr[...] / l_scr[...]).astype(compute_dtype)      # (H, TQ, hd)
        # Merge heads along lanes (tile-aligned: head_dim multiple of 128) and
        # run a single (TQ, D) x (D, D) out_proj matmul + residual.
        attn_cat = jnp.concatenate([attn[h] for h in range(nhead)], axis=-1)
        x1 = xt + bo_ref[...] + jnp.dot(attn_cat, wo_ref[...],
                                        preferred_element_type=jnp.float32)

        # LayerNorm2 (f32).
        mu = jnp.mean(x1, axis=-1, keepdims=True)
        xc = x1 - mu
        var = jnp.mean(xc * xc, axis=-1, keepdims=True)
        y = xc * lax.rsqrt(var + eps) * g2_ref[...] + beta2_ref[...]

        # FFN: relu(y @ W1 + b1) @ W2 + b2.
        # TODO(synk): for large dim_feedforward on v7x (64 MiB VMEM), tile W1/W2
        # along F (extra grid axis + f32 accumulator) instead of full residency.
        h1 = jnp.dot(y.astype(compute_dtype), w1_ref[...],
                     preferred_element_type=jnp.float32) + b1_ref[...]
        h1 = jnp.maximum(h1, 0.0)
        ff = jnp.dot(h1.astype(compute_dtype), w2_ref[...],
                     preferred_element_type=jnp.float32) + b2_ref[...]

        # is_last & memory is None -> no norm3, just the residual.
        out_ref[...] = (ff + x1).astype(out_ref.dtype)


# --------------------------------------------------------------------------
# Wrapper helpers
# --------------------------------------------------------------------------
def _vmem_limit_bytes():
    # v7x: 64 MiB VMEM/TC; v5e/v6e: 128 MiB.  Size the scoped limit to the chip
    # and leave headroom for Pallas pipeline buffers.
    try:
        cap = int(pltpu.get_tpu_info().vmem_capacity_bytes)
    except Exception:
        cap = 64 * 1024 * 1024
    return min((cap * 3) // 4, 100 * 1024 * 1024)


@functools.lru_cache(maxsize=None)
def _resident_weight_spec_builder():
    """BlockSpec builder for constant-index (resident) weights.

    When supported, request a single pipeline buffer (the block is fetched
    once), halving the weights' VMEM footprint (critical on v7x's 64 MiB).
    Falls back to default double-buffered specs if the installed Pallas
    rejects pipeline_mode / Buffered(1).
    """
    def plain(shape, index_map):
        return pl.BlockSpec(shape, index_map)

    if not hasattr(pl, "Buffered"):
        return plain

    def single(shape, index_map):
        return pl.BlockSpec(shape, index_map, pipeline_mode=pl.Buffered(1))

    try:
        def _probe(w_ref, o_ref):
            o_ref[...] = w_ref[...] * 2.0

        probe = pl.pallas_call(
            _probe,
            out_shape=jax.ShapeDtypeStruct((8, 128), jnp.float32),
            grid_spec=pltpu.PrefetchScalarGridSpec(
                num_scalar_prefetch=0,
                grid=(2,),
                in_specs=[single((8, 128), lambda i: (0, 0))],
                out_specs=pl.BlockSpec((8, 128), lambda i: (0, 0)),
            ),
        )
        jax.jit(probe).lower(jnp.zeros((8, 128), jnp.float32)).compile()
        return single
    except Exception:
        return plain


# --------------------------------------------------------------------------
# Wrapper
# --------------------------------------------------------------------------
def transformer_decoder_layer(x, params, *, nhead, layer_norm_eps=1e-5,
                              seq_tile=256, kv_tile=256,
                              compute_dtype=jnp.bfloat16):
    S, D = x.shape
    head_dim = D // nhead
    assert head_dim * nhead == D, "d_model must be divisible by nhead"
    F = params["w1"].shape[1]
    seq_tile = min(seq_tile, S)
    kv_tile = min(kv_tile, S)
    assert S % seq_tile == 0 and S % kv_tile == 0, "sequence must tile evenly"

    cd = compute_dtype
    f32 = jnp.float32

    # ---- one-time weight re-layouts (outside the kernels) ----
    # Fold the softmax 1/sqrt(head_dim) into wq/bq in f32 *before* the bf16
    # cast, and fuse q/k/v into one (D, 3D) weight (natural column order is
    # already head-major) so kernel A does a single wide matmul per tile.
    scale = 1.0 / math.sqrt(head_dim)
    w_qkv = jnp.concatenate(
        [params["wq"].astype(f32) * scale,
         params["wk"].astype(f32),
         params["wv"].astype(f32)], axis=1).astype(cd)               # (D, 3D)
    b_qkv = jnp.concatenate(
        [params["bq"].astype(f32) * scale,
         params["bk"].astype(f32),
         params["bv"].astype(f32)], axis=1).astype(f32)              # (1, 3D)

    wo = params["wo"].astype(cd)            # (D, D); rows = head-major features
    bo = params["bo"].astype(f32)
    g2 = params["g2"].astype(f32)
    beta2 = params["beta2"].astype(f32)
    w1 = params["w1"].astype(cd)
    b1 = params["b1"].astype(f32)
    w2 = params["w2"].astype(cd)
    b2 = params["b2"].astype(f32)

    vmem_limit = _vmem_limit_bytes()
    n_seq = S // seq_tile                  # keep >=2 (and even) on v7x so both
    n_kv = S // kv_tile                    # TensorCores get query tiles.
    resident = _resident_weight_spec_builder()

    # ---------------- kernel A: fused q/k/v input projection ----------------
    q, k, v = pl.pallas_call(
        functools.partial(_qkv_proj_kernel, nhead=nhead, head_dim=head_dim,
                          compute_dtype=cd),
        out_shape=tuple(jax.ShapeDtypeStruct((nhead, S, head_dim), cd)
                        for _ in range(3)),
        grid_spec=pltpu.PrefetchScalarGridSpec(
            num_scalar_prefetch=0,
            grid=(n_seq,),
            in_specs=[
                pl.BlockSpec((seq_tile, D), lambda i: (i, 0)),       # x tile
                resident((D, 3 * D), lambda i: (0, 0)),              # fused W_qkv
                pl.BlockSpec((1, 3 * D), lambda i: (0, 0)),          # fused bias
            ],
            out_specs=[pl.BlockSpec((nhead, seq_tile, head_dim),
                                    lambda i: (0, i, 0))] * 3,
        ),
        compiler_params=pltpu.CompilerParams(
            dimension_semantics=("parallel",),
            vmem_limit_bytes=vmem_limit),
    )(x, w_qkv, b_qkv)

    # ----- kernel B: causal flash attention + out_proj + LN2 + FFN -----
    const2 = lambda i, j: (0, 0)
    # Clamp kv block index so skipped (strictly upper-triangular) tiles do not
    # trigger fresh DMAs.
    kv_map = lambda i, j: (0, jnp.minimum(j, ((i + 1) * seq_tile - 1) // kv_tile), 0)

    out = pl.pallas_call(
        functools.partial(_attn_ffn_kernel, nhead=nhead, head_dim=head_dim,
                          q_tile=seq_tile, kv_tile=kv_tile,
                          eps=layer_norm_eps, compute_dtype=cd),
        out_shape=jax.ShapeDtypeStruct((S, D), x.dtype),
        grid_spec=pltpu.PrefetchScalarGridSpec(
            num_scalar_prefetch=0,
            grid=(n_seq, n_kv),
            in_specs=[
                pl.BlockSpec((seq_tile, D), lambda i, j: (i, 0)),          # x (residual)
                pl.BlockSpec((nhead, seq_tile, head_dim),
                             lambda i, j: (0, i, 0)),                      # q
                pl.BlockSpec((nhead, kv_tile, head_dim), kv_map),          # k
                pl.BlockSpec((nhead, kv_tile, head_dim), kv_map),          # v
                resident((D, D), const2),                                  # wo (resident)
                pl.BlockSpec((1, D), const2),                              # bo
                pl.BlockSpec((1, D), const2),                              # gamma2
                pl.BlockSpec((1, D), const2),                              # beta2
                resident((D, F), const2),                                  # w1 (resident)
                pl.BlockSpec((1, F), const2),                              # b1
                resident((F, D), const2),                                  # w2 (resident)
                pl.BlockSpec((1, D), const2),                              # b2
            ],
            out_specs=pl.BlockSpec((seq_tile, D), lambda i, j: (i, 0)),
            scratch_shapes=[
                pltpu.VMEM((nhead, seq_tile, 1), jnp.float32),         # running max
                pltpu.VMEM((nhead, seq_tile, 1), jnp.float32),         # running denom
                pltpu.VMEM((nhead, seq_tile, head_dim), jnp.float32),  # acc
            ],
        ),
        compiler_params=pltpu.CompilerParams(
            dimension_semantics=("parallel", "arbitrary"),
            vmem_limit_bytes=vmem_limit),
    )(x, q, k, v, wo, bo, g2, beta2, w1, b1, w2, b2)
    return out


# --------------------------------------------------------------------------
# Pure-JAX reference (mirrors the PyTorch forward and the kernel's cast points)
# --------------------------------------------------------------------------
def _reference(x, p, *, nhead, eps=1e-5, compute_dtype=jnp.bfloat16):
    S, D = x.shape
    hd = D // nhead
    cd = compute_dtype

    def mm(a, w):
        return jnp.dot(a.astype(cd), w.astype(cd),
                       preferred_element_type=jnp.float32)

    q = (mm(x, p["wq"]) + p["bq"]).astype(cd)
    k = (mm(x, p["wk"]) + p["bk"]).astype(cd)
    v = (mm(x, p["wv"]) + p["bv"]).astype(cd)
    qh = q.reshape(S, nhead, hd).transpose(1, 0, 2)
    kh = k.reshape(S, nhead, hd).transpose(1, 0, 2)
    vh = v.reshape(S, nhead, hd).transpose(1, 0, 2)
    s = jnp.einsum("hqd,hkd->hqk", qh, kh,
                   preferred_element_type=jnp.float32) / math.sqrt(hd)
    mask = jnp.tril(jnp.ones((S, S), dtype=bool))
    s = jnp.where(mask[None], s, jnp.float32(-1e30))
    pm = jax.nn.softmax(s, axis=-1)
    attn = jnp.einsum("hqk,hkd->hqd", pm.astype(cd), vh,
                      preferred_element_type=jnp.float32)
    attn2d = attn.transpose(1, 0, 2).reshape(S, D)
    x1 = mm(attn2d, p["wo"]) + p["bo"] + x
    mu = x1.mean(-1, keepdims=True)
    var = ((x1 - mu) ** 2).mean(-1, keepdims=True)
    y = (x1 - mu) * lax.rsqrt(var + eps) * p["g2"] + p["beta2"]
    h1 = jnp.maximum(mm(y, p["w1"]) + p["b1"], 0.0)
    ff = mm(h1, p["w2"]) + p["b2"]
    return ff + x1


def _init_params(key, d_model, dim_feedforward):
    ks = jax.random.split(key, 8)

    def lin(k, fan_in, fan_out):
        bound = 1.0 / math.sqrt(fan_in)
        kw, kb = jax.random.split(k)
        w = jax.random.uniform(kw, (fan_in, fan_out), jnp.float32, -bound, bound)
        b = jax.random.uniform(kb, (1, fan_out), jnp.float32, -bound, bound)
        return w, b

    wq, bq = lin(ks[0], d_model, d_model)
    wk, bk = lin(ks[1], d_model, d_model)
    wv, bv = lin(ks[2], d_model, d_model)
    wo, bo = lin(ks[3], d_model, d_model)
    w1, b1 = lin(ks[4], d_model, dim_feedforward)
    w2, b2 = lin(ks[5], dim_feedforward, d_model)
    g2 = jnp.ones((1, d_model), jnp.float32)
    beta2 = jnp.zeros((1, d_model), jnp.float32)
    return dict(wq=wq, bq=bq, wk=wk, bk=bk, wv=wv, bv=bv, wo=wo, bo=bo,
                g2=g2, beta2=beta2, w1=w1, b1=b1, w2=w2, b2=b2)


if __name__ == "__main__":
    SEQ = 512          # 2 sequence tiles of 256 -> exercises grid, skip & megacore
    D_MODEL = 256      # multiple of 128 (lane-dense)
    NHEAD = 2          # head_dim = 128 -> lane-dense head tiles
    DIM_FF = 512

    key = jax.random.PRNGKey(0)
    kx, kp = jax.random.split(key)
    x = jax.random.normal(kx, (SEQ, D_MODEL), jnp.float32)
    params = _init_params(kp, D_MODEL, DIM_FF)

    out = transformer_decoder_layer(x, params, nhead=NHEAD)
    out = jax.block_until_ready(out)

    ref = _reference(x, params, nhead=NHEAD)
    assert out.shape == (SEQ, D_MODEL)
    assert jnp.allclose(out, ref, atol=5e-2, rtol=5e-2), (
        "mismatch vs reference: max abs err "
        f"{float(jnp.max(jnp.abs(out - ref)))}")

    # TODO(synk): MoE path (moe_kwargs != {}), cross-attention / memory path
    # (with_memory=True), and token/positional embedding path (do_embedding=True)
    # are not exercised by this config and are not implemented here.
    print("KERNEL_OK")
</pallas_src>

<mosaic_0001>
module attributes {stable_mosaic.version = 11 : i64} {
  func.func @_qkv_proj_kernel(%arg0: i32, %arg1: memref<256x256xf32, #tpu.memory_space<vmem>>, %arg2: memref<256x768xbf16, #tpu.memory_space<vmem>>, %arg3: memref<1x768xf32, #tpu.memory_space<vmem>>, %arg4: memref<2x256x128xbf16, #tpu.memory_space<vmem>>, %arg5: memref<2x256x128xbf16, #tpu.memory_space<vmem>>, %arg6: memref<2x256x128xbf16, #tpu.memory_space<vmem>>) attributes {dimension_semantics = [#tpu.dimension_semantics<parallel>], iteration_bounds = array<i64: 2>, scalar_prefetch = 0 : i64, scratch_operands = 0 : i64, tpu.core_type = #tpu.core_type<tc>, window_params = [{transform_indices = @transform_0, window_bounds = array<i64: 256, 256>}, {pipeline_mode = #tpu.pipeline_mode<synchronous>, transform_indices = @transform_1, window_bounds = array<i64: 256, 768>}, {pipeline_mode = #tpu.pipeline_mode<synchronous>, transform_indices = @transform_2, window_bounds = array<i64: 1, 768>}, {transform_indices = @transform_3, window_bounds = array<i64: 2, 256, 128>}, {transform_indices = @transform_4, window_bounds = array<i64: 2, 256, 128>}, {transform_indices = @transform_5, window_bounds = array<i64: 2, 256, 128>}]} {
    %c0 = arith.constant 0 : index
    %c0_0 = arith.constant 0 : index
    %0 = vector.load %arg1[%c0, %c0_0] : memref<256x256xf32, #tpu.memory_space<vmem>>, vector<256x256xf32>
    %1 = arith.truncf %0 : vector<256x256xf32> to vector<256x256xbf16>
    %c0_1 = arith.constant 0 : index
    %c0_2 = arith.constant 0 : index
    %2 = vector.load %arg2[%c0_1, %c0_2] : memref<256x768xbf16, #tpu.memory_space<vmem>>, vector<256x768xbf16>
    %cst = arith.constant dense<0.000000e+00> : vector<256x768xf32>
    %3 = tpu.matmul %1, %2, %cst {dimension_numbers = #tpu.dot_dimension_numbers<[1], [0], [0], [1], [0, 0, 1, 1], [], []>} : vector<256x256xbf16>, vector<256x768xbf16>, vector<256x768xf32> -> vector<256x768xf32>
    %c0_3 = arith.constant 0 : index
    %c0_4 = arith.constant 0 : index
    %4 = vector.load %arg3[%c0_3, %c0_4] : memref<1x768xf32, #tpu.memory_space<vmem>>, vector<1x768xf32>
    %5 = vector.broadcast %4 : vector<1x768xf32> to vector<256x768xf32>
    %6 = arith.addf %3, %5 : vector<256x768xf32>
    %7 = vector.extract_strided_slice %6 {offsets = [0, 0], sizes = [256, 128], strides = [1, 1]} : vector<256x768xf32> to vector<256x128xf32>
    %8 = arith.truncf %7 : vector<256x128xf32> to vector<256x128xbf16>
    %c0_5 = arith.constant 0 : index
    %c0_6 = arith.constant 0 : index
    %c0_7 = arith.constant 0 : index
    %9 = vector.load %arg4[%c0_5, %c0_6, %c0_7] : memref<2x256x128xbf16, #tpu.memory_space<vmem>>, vector<1x256x128xbf16>
    %10 = vector.shape_cast %9 : vector<1x256x128xbf16> to vector<256x128xbf16>
    %11 = vector.shape_cast %8 : vector<256x128xbf16> to vector<1x256x128xbf16>
    tpu.vector_store %arg4[%c0_5, %c0_6, %c0_7], %11 {strides = array<i32>} : memref<2x256x128xbf16, #tpu.memory_space<vmem>>, vector<1x256x128xbf16>,
    %12 = vector.extract_strided_slice %6 {offsets = [0, 256], sizes = [256, 128], strides = [1, 1]} : vector<256x768xf32> to vector<256x128xf32>
    %13 = arith.truncf %12 : vector<256x128xf32> to vector<256x128xbf16>
    %c0_8 = arith.constant 0 : index
    %c0_9 = arith.constant 0 : index
    %c0_10 = arith.constant 0 : index
    %14 = vector.load %arg5[%c0_8, %c0_9, %c0_10] : memref<2x256x128xbf16, #tpu.memory_space<vmem>>, vector<1x256x128xbf16>
    %15 = vector.shape_cast %14 : vector<1x256x128xbf16> to vector<256x128xbf16>
    %16 = vector.shape_cast %13 : vector<256x128xbf16> to vector<1x256x128xbf16>
    tpu.vector_store %arg5[%c0_8, %c0_9, %c0_10], %16 {strides = array<i32>} : memref<2x256x128xbf16, #tpu.memory_space<vmem>>, vector<1x256x128xbf16>,
    %17 = vector.extract_strided_slice %6 {offsets = [0, 512], sizes = [256, 128], strides = [1, 1]} : vector<256x768xf32> to vector<256x128xf32>
    %18 = arith.truncf %17 : vector<256x128xf32> to vector<256x128xbf16>
    %c0_11 = arith.constant 0 : index
    %c0_12 = arith.constant 0 : index
    %c0_13 = arith.constant 0 : index
    %19 = vector.load %arg6[%c0_11, %c0_12, %c0_13] : memref<2x256x128xbf16, #tpu.memory_space<vmem>>, vector<1x256x128xbf16>
    %20 = vector.shape_cast %19 : vector<1x256x128xbf16> to vector<256x128xbf16>
    %21 = vector.shape_cast %18 : vector<256x128xbf16> to vector<1x256x128xbf16>
    tpu.vector_store %arg6[%c0_11, %c0_12, %c0_13], %21 {strides = array<i32>} : memref<2x256x128xbf16, #tpu.memory_space<vmem>>, vector<1x256x128xbf16>,
    %22 = vector.extract_strided_slice %6 {offsets = [0, 128], sizes = [256, 128], strides = [1, 1]} : vector<256x768xf32> to vector<256x128xf32>
    %23 = arith.truncf %22 : vector<256x128xf32> to vector<256x128xbf16>
    %c1 = arith.constant 1 : index
    %c0_14 = arith.constant 0 : index
    %c0_15 = arith.constant 0 : index
    %24 = vector.load %arg4[%c1, %c0_14, %c0_15] : memref<2x256x128xbf16, #tpu.memory_space<vmem>>, vector<1x256x128xbf16>
    %25 = vector.shape_cast %24 : vector<1x256x128xbf16> to vector<256x128xbf16>
    %26 = vector.shape_cast %23 : vector<256x128xbf16> to vector<1x256x128xbf16>
    tpu.vector_store %arg4[%c1, %c0_14, %c0_15], %26 {strides = array<i32>} : memref<2x256x128xbf16, #tpu.memory_space<vmem>>, vector<1x256x128xbf16>,
    %27 = vector.extract_strided_slice %6 {offsets = [0, 384], sizes = [256, 128], strides = [1, 1]} : vector<256x768xf32> to vector<256x128xf32>
    %28 = arith.truncf %27 : vector<256x128xf32> to vector<256x128xbf16>
    %c1_16 = arith.constant 1 : index
    %c0_17 = arith.constant 0 : index
    %c0_18 = arith.constant 0 : index
    %29 = vector.load %arg5[%c1_16, %c0_17, %c0_18] : memref<2x256x128xbf16, #tpu.memory_space<vmem>>, vector<1x256x128xbf16>
    %30 = vector.shape_cast %29 : vector<1x256x128xbf16> to vector<256x128xbf16>
    %31 = vector.shape_cast %28 : vector<256x128xbf16> to vector<1x256x128xbf16>
    tpu.vector_store %arg5[%c1_16, %c0_17, %c0_18], %31 {strides = array<i32>} : memref<2x256x128xbf16, #tpu.memory_space<vmem>>, vector<1x256x128xbf16>,
    %32 = vector.extract_strided_slice %6 {offsets = [0, 640], sizes = [256, 128], strides = [1, 1]} : vector<256x768xf32> to vector<256x128xf32>
    %33 = arith.truncf %32 : vector<256x128xf32> to vector<256x128xbf16>
    %c1_19 = arith.constant 1 : index
    %c0_20 = arith.constant 0 : index
    %c0_21 = arith.constant 0 : index
    %34 = vector.load %arg6[%c1_19, %c0_20, %c0_21] : memref<2x256x128xbf16, #tpu.memory_space<vmem>>, vector<1x256x128xbf16>
    %35 = vector.shape_cast %34 : vector<1x256x128xbf16> to vector<256x128xbf16>
    %36 = vector.shape_cast %33 : vector<256x128xbf16> to vector<1x256x128xbf16>
    tpu.vector_store %arg6[%c1_19, %c0_20, %c0_21], %36 {strides = array<i32>} : memref<2x256x128xbf16, #tpu.memory_space<vmem>>, vector<1x256x128xbf16>,
    return
  }
  func.func @transform_0(%arg0: i32) -> (i32, i32) {
    %c0_i32 = arith.constant 0 : i32
    %c0_i32_0 = arith.constant 0 : i32
    return %arg0, %c0_i32 : i32, i32
  }
  func.func @transform_1(%arg0: i32) -> (i32, i32) {
    %c0_i32 = arith.constant 0 : i32
    %c0_i32_0 = arith.constant 0 : i32
    %c0_i32_1 = arith.constant 0 : i32
    return %c0_i32, %c0_i32_0 : i32, i32
  }
  func.func @transform_2(%arg0: i32) -> (i32, i32) {
    %c0_i32 = arith.constant 0 : i32
    %c0_i32_0 = arith.constant 0 : i32
    %c0_i32_1 = arith.constant 0 : i32
    return %c0_i32, %c0_i32_0 : i32, i32
  }
  func.func @transform_3(%arg0: i32) -> (i32, i32, i32) {
    %c0_i32 = arith.constant 0 : i32
    %c0_i32_0 = arith.constant 0 : i32
    %c0_i32_1 = arith.constant 0 : i32
    return %c0_i32, %arg0, %c0_i32_0 : i32, i32, i32
  }
  func.func @transform_4(%arg0: i32) -> (i32, i32, i32) {
    %c0_i32 = arith.constant 0 : i32
    %c0_i32_0 = arith.constant 0 : i32
    %c0_i32_1 = arith.constant 0 : i32
    return %c0_i32, %arg0, %c0_i32_0 : i32, i32, i32
  }
  func.func @transform_5(%arg0: i32) -> (i32, i32, i32) {
    %c0_i32 = arith.constant 0 : i32
    %c0_i32_0 = arith.constant 0 : i32
    %c0_i32_1 = arith.constant 0 : i32
    return %c0_i32, %arg0, %c0_i32_0 : i32, i32, i32
  }
}

</mosaic_0001>

<bundles_post_ra>
// kernel: tpu_custom_call.1
= control target key start
LH: loop header
LB: loop body
LE: loop exit
PB: predicated region body
PF: predicated region fallthrough
CT: control target
= control target key end

     0   :  { %11 = vsyncpa [#allocation3], 0  ;;  %s5235_s0 = inlined_call_operand.hbm [shape: f32[512,256], index: 0, kind: input, shape index: {}]   ;;  %s5236_s1 = inlined_call_operand.hbm [shape: bf16[256,768], index: 1, kind: input, shape index: {}]   ;;  %s5237_s2 = inlined_call_operand.vmem [shape: f32[1,768], index: 2, kind: input, shape index: {}]   ;;  %s5238_s3 = inlined_call_operand.hbm [shape: bf16[2,512,128], index: 3, kind: output, shape index: {0}]   ;;  %s5239_s4 = inlined_call_operand.hbm [shape: bf16[2,512,128], index: 4, kind: output, shape index: {1}]   ;;  %s5240_s5 = inlined_call_operand.hbm [shape: bf16[2,512,128], index: 5, kind: output, shape index: {2}]  }
   0x1   :  { %13 = vsyncpa [#allocation3 + $0x1], 0 }
   0x2   :  { %14 = vsyncpa [#allocation6], 0 }
   0x3   :  { %15 = vsyncpa [#allocation4], 0 }
   0x4   :  { %17 = vsyncpa [#allocation4 + $0x1], 0 }
   0x5   :  { %18 = vsyncpa [#allocation9], 0 }
   0x6   :  { %20 = vsyncpa [#allocation9 + $0x1], 0  ;;  %s4442_s18 = smov 0   ;;  %s4444_s19 = smov 0  }
   0x7   :  { %s4446_s20 = smov 0   ;;  %s4448_s21 = smov 0  }
   0x8 LB: > { %s4463_s22 = sadd.s32 4294967295, %s4383_s21   ;;  %s2814_s23 = sadd.s32 4294967294, %s4383_s21   ;;  %s4383_s21 = sphi %s4448_s21, %s5260_s21   ;;  %s4379_s20 = sphi %s4446_s20, %s5259_s20   ;;  %s4375_s19 = sphi %s4444_s19, %s5258_s19   ;;  %s4371_s18 = sphi %s4442_s18, %s5257_s18  }
   0x9   : > { %p46_p0 = scmp.ne.s32.totalorder %s4375_s19, %s4371_s18  ;;  %p5241_p1 = scmp.eq.s32.totalorder %s4463_s22, 0 }
   0xa   : > { %p118_p3 = scmp.eq.s32.totalorder %s2814_s23, 1  ;;  %p2815_p5 = scmp.ge.s32.totalorder %s4383_s21, 1 }
   0xb   : > { %p4474_p4 = por %p5241_p1, %p46_p0  ;;  %p177_p7 = scmp.lt.s32.totalorder %s4383_s21, 3 }
   0xc   : > { %p4479_p6 = por %p118_p3, %p46_p0  ;;  %s4385_s27 = smov [#allocation5]  }
   0xd   : > { %s5244_s24 = scalar_select %p4474_p4, 1, 0 }
   0xe   : > { %s5245_s25 = scalar_select %p4479_p6, 1, 0 }
   0xf   : > { %p4484_p8 = pnand %p2815_p5, %p177_p7  ;;  %s189_s28 = sshll.u32 %s4385_s27, 4  ;;  %s4488_s28 = int_to_ptr.vmem [resolvable:$true] %s189_s28 }
  0x10   : > { %s4500_s30 = sadd.s32 1, %s4383_s21   ;;  %s33_s6 = sadd.s32 1, %s4379_s20 }
  0x11   : > { %s5246_s26 = scalar_select %p4484_p8, 1, 0 }
  0x12   : > { %p4055_p9 = pneg %p4484_p8  ;;  %s30_s7 = ssub.s32 %s4383_s21, %s4500_s30 }
  0x13   : > { %s4279_s10 = scalar_lea.hbm %s5236_s1, 12288 }
  0x14   : > { %p4495_p11 = pnand %p4055_p9, %p5241_p1  ;;  %p4280_p12 = scmp.ne.s32.totalorder %s5236_s1, %s4279_s10 }
  0x15   : > { %p4286_p5 = scmp.lt.u32.totalorder %s4279_s10, %s5236_s1 }
  0x16   : > { %p4281_p13 = pneg %p4495_p11 }
  0x18   : > { %p4282_p0 = pnand %p4281_p13, %p4280_p12 }
  0x1a   : > { %p4283_p3 = pneg %p4282_p0 }
  0x1c   : > { %p4288_p7 = pnand %p4286_p5, %p4283_p3 }
  0x1e   : > { %4291 = shalt.err (!%p4288_p7)
}
  0x1f   : > { %s4292_s15 = scalar_lea.vmem %s4488_s28, 12288  ;;  %p4300_p2 = scmp.lt.s32.totalorder %s4488_s28, %s4488_s28 }
  0x20   : > { %p4293_p9 = scmp.ne.s32.totalorder %s4488_s28, %s4292_s15  ;;  %p4301_p6 = scmp.lt.s32.totalorder %s4292_s15, %s4292_s15 }
  0x22   : > { %p4295_p10 = pnand %p4293_p9, %p4281_p13  ;;  %p4302_p4 = por %p4301_p6, %p4300_p2 }
  0x24   : > { %p4296_p1 = pneg %p4295_p10 }
  0x26   : > { %p4303_p8 = pnand %p4302_p4, %p4296_p1 }
  0x28   : > { %4306 = shalt.err (!%p4303_p8)
}
  0x29   : > { %s4386_s16 = smov 384   ;;  %s4387_s17 = smov 24  }
  0x2a   : > { %4058 = dma.hbm_to_vmem [thread:$0]  (!%p4495_p11), %s5236_s1, 12288, %s4488_s28, [#allocation6], %s4386_s16, %s4386_s16, %s4387_s17  }
  0x2b   : > { %p31_p2 = scmp.eq.s32.totalorder %s30_s7, 0  ;;  %p40_p1 = scmp.ne.s32.totalorder %s4379_s20, %s4375_s19 }
  0x2c   : > { %p41_p4 = scmp.eq.s32.totalorder %s4383_s21, 0  ;;  %p4074_p6 = scmp.lt.s32.totalorder %s4383_s21, 2 }
  0x2d   : > { %s4531_s9 = scalar_select %p31_p2, %s4379_s20, %s33_s6  }
  0x2e   : > { %p42_p8 = por %p41_p4, %p40_p1  ;;  %p5248_p10 = scmp.eq.s32.totalorder %s4463_s22, 1 }
  0x2f   : > { %s206_s11 = sand.u32 1, %s4379_s20   ;;  %s3224_s12 = sshll.u32 %s4383_s21, 13 }
  0x30   : > { %p4535_p12 = por %p5248_p10, %p40_p1  ;;  %s2818_s13 = sshll.u32 %s206_s11, 9 }
  0x31   : > { %s4544_s15 = scalar_lea.hbm %s5235_s0, %s3224_s12  ;;  %s210_s28 = scalar_lea.vmem [#allocation2], %s2818_s13 }
  0x32   : > { %s218_s6 = sshll.u32 %s210_s28, 4  ;;  %p4546_p11 = pnand %p4074_p6, %p42_p8  ;;  %s4550_s6 = int_to_ptr.vmem [resolvable:$true] %s218_s6 }
  0x33   : > { %s4552_s16 = scalar_lea.sflag [#allocation3], %s206_s11  ;;  %s4307_s17 = scalar_lea.hbm %s4544_s15, 8192 }
  0x34   : > { %p4308_p13 = scmp.ne.s32.totalorder %s4544_s15, %s4307_s17  ;;  %p4309_p0 = pneg %p4546_p11 }
  0x35   : > { %s4312_s12 = scalar_lea.hbm %s5235_s0, 16384  ;;  %p4313_p7 = scmp.lt.u32.totalorder %s4544_s15, %s5235_s0 }
  0x36   : > { %p4310_p3 = pnand %p4309_p0, %p4308_p13  ;;  %p4314_p9 = scmp.lt.u32.totalorder %s4312_s12, %s4307_s17 }
  0x37   : > { %p4316_p1 = scmp.lt.u32.totalorder %s4307_s17, %s4544_s15 }
  0x38   : > { %p4311_p5 = pneg %p4310_p3  ;;  %p4315_p2 = por %p4314_p9, %p4313_p7 }
  0x3a   : > { %p4317_p4 = por %p4316_p1, %p4315_p2 }
  0x3c   : > { %p4318_p6 = pnand %p4317_p4, %p4311_p5 }
  0x3e   : > { %4321 = shalt.err (!%p4318_p6)
}
  0x3f   : > { %s4322_s11 = scalar_lea.vmem %s4550_s6, 8192  ;;  %s4388_s14 = smov [#allocation2]  }
  0x40   : > { %p4323_p8 = scmp.ne.s32.totalorder %s4550_s6, %s4322_s11  ;;  %s4327_s28 = sshll.u32 %s4388_s14, 4  ;;  %s4328_s28 = int_to_ptr.vmem [resolvable:$false] %s4327_s28 }
  0x41   : > { %s4329_s27 = scalar_lea.vmem %s4328_s28, 16384  ;;  %p4330_p3 = scmp.lt.s32.totalorder %s4550_s6, %s4328_s28 }
  0x42   : > { %p4325_p10 = pnand %p4323_p8, %p4309_p0  ;;  %p4331_p7 = scmp.lt.s32.totalorder %s4329_s27, %s4322_s11 }
  0x44   : > { %p4326_p13 = pneg %p4325_p10  ;;  %p4332_p9 = por %p4331_p7, %p4330_p3 }
  0x46   : > { %p4333_p2 = pnand %p4332_p9, %p4326_p13 }
  0x48   : > { %4336 = shalt.err (!%p4333_p2)
}
  0x49   : > { %s4389_s17 = smov 256   ;;  %s4390_s8 = smov 16  }
  0x4a   : > { %4062 = dma.hbm_to_vmem [thread:$0]  (!%p4546_p11), %s4544_s15, 8192, %s4550_s6, %s4552_s16, %s4389_s17, %s4389_s17, %s4390_s8  }
  0x4b   : > { %p5251_p0 = scmp.ne.s32.totalorder %s5246_s26, 0 }
  0x4c   : > { %s4583_s12 = sand.u32 (!%p5251_p0), 1, %s4375_s19   ;;  %p5252_p5 = scmp.ne.s32.totalorder (!%p5251_p0), %s5244_s24, 0 }
  0x4d   : > { %230 = sbr.rel (%p5251_p0) target bundleno = 584 (0x248), region = 32  ;;  %s2823_s13 = sshll.u32 (!%p5251_p0), %s4583_s12, 9 }
  0x4e   : > { %s233_s29 = scalar_lea.sflag (!%p5251_p0), [#allocation3], %s4583_s12  ;;  %s4587_s11 = scalar_lea.vmem (!%p5251_p0), [#allocation2], %s2823_s13 }
  0x54   : > { %4354 = dma.done.wait (%p5252_p5), %s233_s29, 8192  }
  0x55   : > { %4356 = vsyncadd (%p5252_p5), %s233_s29, 4294959104  ;;  %p5253_p11 = scmp.eq.s32.totalorder %s4463_s22, 0 }
  0x57   : > { %4358 = dma.done.wait (%p5253_p11), [#allocation6], 12288   ;;  %p5254_p1 = pmov %p5253_p11 }
  0x58   : > { %v4135_v0 = vld [vmem:[#allocation5 + $0x4] ss:$24 sps:$4 sm:$0xff]   ;;  %v4137_v1 = vld [vmem:[#allocation5] ss:$24 sps:$4 sm:$0xff]   ;;  %v4138_v2 = vld [vmem:[#allocation5 + $0x34] ss:$24 sps:$4 sm:$0xff]  }
  0x59   : > { %4360 = vsyncadd (%p5254_p1), [#allocation6], 4294955008  ;;  %985 = vmatprep.subr.bf16.mxu0 %v4135_v0  ;;  %3993 = vmatprep.subr.bf16.mxu1 %v4135_v0  ;;  %v4140_v3 = vld [vmem:[#allocation5 + $0x30] ss:$24 sps:$4 sm:$0xff]   ;;  %v4141_v4 = vld [vmem:[#allocation5 + $0x64] ss:$24 sps:$4 sm:$0xff]  }
  0x5a   : > { %986 = vmatpush1.bf16.msra.mxu0 %v4137_v1  ;;  %4009 = vmatpush1.bf16.msra.mxu1 %v4137_v1  ;;  %v4143_v5 = vld [vmem:[#allocation5 + $0x60] ss:$24 sps:$4 sm:$0xff]   ;;  %v4144_v6 = vld [vmem:[#allocation5 + $0x94] ss:$24 sps:$4 sm:$0xff]   ;;  %v4146_v7 = vld [vmem:[#allocation5 + $0x90] ss:$24 sps:$4 sm:$0xff]  }
  0x5b   : > { %987 = vmatprep.subr.bf16.mxu0 %v4138_v2  ;;  %3994 = vmatprep.subr.bf16.mxu1 %v4138_v2  ;;  %v4147_v8 = vld [vmem:[#allocation5 + $0xc4] ss:$24 sps:$4 sm:$0xff]   ;;  %v4149_v9 = vld [vmem:[#allocation5 + $0xc0] ss:$24 sps:$4 sm:$0xff]   ;;  %v4150_v10 = vld [vmem:[#allocation5 + $0xf4] ss:$24 sps:$4 sm:$0xff]  }
  0x5c   : > { %v4152_v11 = vld [vmem:[#allocation5 + $0xf0] ss:$24 sps:$4 sm:$0xff]   ;;  %v4153_v12 = vld [vmem:[#allocation5 + $0x124] ss:$24 sps:$4 sm:$0xff]   ;;  %v4155_v18 = vld [vmem:[#allocation5 + $0x120] ss:$24 sps:$4 sm:$0xff]  }
  0x5d   : > { %v282_v13 = vld [vmem:[%s4587_s11 + $0x8] sm:$0xff]  ;;  %v284_v14 = vld [vmem:[%s4587_s11 + $0x18] sm:$0xff]  ;;  %v281_v38 = vld [vmem:[%s4587_s11] sm:$0xff]  ;;  %s4832_s15 = sshll.u32 %s4583_s12, 8  ;;  %s2532_s7 = sand.u32 1, %s4463_s22  }
  0x5e   : > { %988 = vmatpush1.bf16.msra.mxu0 %v4140_v3  ;;  %4010 = vmatpush1.bf16.msra.mxu1 %v4140_v3  ;;  %v4599_v15 = vpack.c.bf16 %v284_v14, %v282_v13  ;;  %v314_v16 = vld [vmem:[%s4587_s11 + $0x108] sm:$0xff]  ;;  %v316_v17 = vld [vmem:[%s4587_s11 + $0x118] sm:$0xff]  ;;  %v283_v39 = vld [vmem:[%s4587_s11 + $0x10] sm:$0xff]  ;;  %s4843_s6 = scalar_lea.vmem [#allocation7], %s4832_s15  ;;  %s4959_s16 = scalar_lea.vmem [#allocation8], %s4832_s15 }
  0x5f   : > { %989 = vmatprep.subr.bf16.mxu0 %v4141_v4  ;;  %3995 = vmatprep.subr.bf16.mxu1 %v4141_v4  ;;  %v4603_v19 = vpack.c.bf16 %v316_v17, %v314_v16  ;;  %v4156_v20 = vld [vmem:[#allocation5 + $0x154] ss:$24 sps:$4 sm:$0xff]   ;;  %v4158_v21 = vld [vmem:[#allocation5 + $0x150] ss:$24 sps:$4 sm:$0xff]   ;;  %v4159_v22 = vld [vmem:[#allocation5 + $0x184] ss:$24 sps:$4 sm:$0xff]   ;;  %v4612_v45 = vpack.c.bf16 %v283_v39, %v281_v38 }
  0x60   : > { %1017 = vmatprep.mubr.bf16.mxu0 %v4599_v15  ;;  %v4161_v23 = vld [vmem:[#allocation5 + $0x180] ss:$24 sps:$4 sm:$0xff]   ;;  %v4162_v24 = vld [vmem:[#allocation5 + $0x1b4] ss:$24 sps:$4 sm:$0xff]   ;;  %v4164_v25 = vld [vmem:[#allocation5 + $0x1b0] ss:$24 sps:$4 sm:$0xff]  }
  0x61   : > { %1097 = vmatprep.mubr.bf16.mxu1 %v4603_v19  ;;  %v4165_v26 = vld [vmem:[#allocation5 + $0x1e4] ss:$24 sps:$4 sm:$0xff]   ;;  %v4167_v27 = vld [vmem:[#allocation5 + $0x1e0] ss:$24 sps:$4 sm:$0xff]   ;;  %v4168_v28 = vld [vmem:[#allocation5 + $0x214] ss:$24 sps:$4 sm:$0xff]  }
  0x62   : > { %990 = vmatpush1.bf16.msra.mxu0 %v4143_v5  ;;  %4011 = vmatpush1.bf16.msra.mxu1 %v4143_v5  ;;  %v4170_v29 = vld [vmem:[#allocation5 + $0x210] ss:$24 sps:$4 sm:$0xff]   ;;  %v4171_v30 = vld [vmem:[#allocation5 + $0x244] ss:$24 sps:$4 sm:$0xff]   ;;  %v4173_v31 = vld [vmem:[#allocation5 + $0x240] ss:$24 sps:$4 sm:$0xff]  }
  0x63   : > { %991 = vmatprep.subr.bf16.mxu0 %v4144_v6  ;;  %3996 = vmatprep.subr.bf16.mxu1 %v4144_v6  ;;  %v4174_v32 = vld [vmem:[#allocation5 + $0x274] ss:$24 sps:$4 sm:$0xff]   ;;  %v4176_v33 = vld [vmem:[#allocation5 + $0x270] ss:$24 sps:$4 sm:$0xff]   ;;  %v4177_v34 = vld [vmem:[#allocation5 + $0x2a4] ss:$24 sps:$4 sm:$0xff]  }
  0x64   : > { %v4179_v35 = vld [vmem:[#allocation5 + $0x2a0] ss:$24 sps:$4 sm:$0xff]   ;;  %v4180_v36 = vld [vmem:[#allocation5 + $0x2d4] ss:$24 sps:$4 sm:$0xff]   ;;  %v4182_v37 = vld [vmem:[#allocation5 + $0x2d0] ss:$24 sps:$4 sm:$0xff]  }
  0x65   : > { %v313_v40 = vld [vmem:[%s4587_s11 + $0x100] sm:$0xff]  ;;  %v315_v41 = vld [vmem:[%s4587_s11 + $0x110] sm:$0xff]  ;;  %v286_v44 = vld [vmem:[%s4587_s11 + $0x28] sm:$0xff]  ;;  %s4963_s14 = scalar_lea.vmem [#allocation10], %s4832_s15  ;;  %s2528_s28 = scalar_lea.sflag [#allocation4], %s4583_s12 }
  0x66   : > { %992 = vmatpush1.bf16.msra.mxu0 %v4146_v7  ;;  %4012 = vmatpush1.bf16.msra.mxu1 %v4146_v7  ;;  %v4185_v42 = vld [vmem:[#allocation5 + $0xc] ss:$24 sps:$4 sm:$0xff]   ;;  %v4614_v46 = vpack.c.bf16 %v315_v41, %v313_v40  ;;  %v288_v47 = vld [vmem:[%s4587_s11 + $0x38] sm:$0xff]  ;;  %v4183_v50 = vld [vmem:[#allocation5 + $0x8] ss:$24 sps:$4 sm:$0xff]   ;;  %s5151_s27 = scalar_lea.sflag [#allocation9], %s2532_s7 }
  0x67   : > { %993 = vmatprep.subr.bf16.mxu0 %v4147_v8  ;;  %3997 = vmatprep.subr.bf16.mxu1 %v4147_v8  ;;  %v4188_v43 = vld [vmem:[#allocation5 + $0x14] ss:$24 sps:$4 sm:$0xff]   ;;  %v320_v49 = vld [vmem:[%s4587_s11 + $0x138] sm:$0xff]  ;;  %v4186_v51 = vld [vmem:[#allocation5 + $0x10] ss:$24 sps:$4 sm:$0xff]   ;;  %v4619_v56 = vpack.c.bf16 %v288_v47, %v286_v44 }
  0x68   : > { %v318_v48 = vld [vmem:[%s4587_s11 + $0x128] sm:$0xff]  ;;  %v4191_v52 = vld [vmem:[#allocation5 + $0x3c] ss:$24 sps:$4 sm:$0xff]   ;;  %v4189_v54 = vld [vmem:[#allocation5 + $0x38] ss:$24 sps:$4 sm:$0xff]  }
  0x69   : > { %v4194_v53 = vld [vmem:[#allocation5 + $0x44] ss:$24 sps:$4 sm:$0xff]   ;;  %v4192_v55 = vld [vmem:[#allocation5 + $0x40] ss:$24 sps:$4 sm:$0xff]   ;;  %v4621_v57 = vpack.c.bf16 %v320_v49, %v318_v48  ;;  %v287_v59 = vld [vmem:[%s4587_s11 + $0x30] sm:$0xff] }
  0x6a   : > { %994 = vmatpush1.bf16.msra.mxu0 %v4149_v9  ;;  %4013 = vmatpush1.bf16.msra.mxu1 %v4149_v9  ;;  %v285_v58 = vld [vmem:[%s4587_s11 + $0x20] sm:$0xff]  ;;  %v319_v61 = vld [vmem:[%s4587_s11 + $0x130] sm:$0xff]  ;;  %v290_v0 = vld [vmem:[%s4587_s11 + $0x48] sm:$0xff] }
  0x6b   : > { %995 = vmatprep.subr.bf16.mxu0 %v4150_v10  ;;  %3998 = vmatprep.subr.bf16.mxu1 %v4150_v10  ;;  %v317_v60 = vld [vmem:[%s4587_s11 + $0x120] sm:$0xff]  ;;  %v4200_v63 = vld [vmem:[#allocation5 + $0x74] ss:$24 sps:$4 sm:$0xff]   ;;  %v4632_v1 = vpack.c.bf16 %v287_v59, %v285_v58  ;;  %v292_v3 = vld [vmem:[%s4587_s11 + $0x58] sm:$0xff] }
  0x6c   : > { %v4197_v62 = vld [vmem:[#allocation5 + $0x6c] ss:$24 sps:$4 sm:$0xff]   ;;  %v4634_v2 = vpack.c.bf16 %v319_v61, %v317_v60  ;;  %v324_v5 = vld [vmem:[%s4587_s11 + $0x158] sm:$0xff]  ;;  %v4195_v6 = vld [vmem:[#allocation5 + $0x68] ss:$24 sps:$4 sm:$0xff]  }
  0x6d   : > { %v322_v4 = vld [vmem:[%s4587_s11 + $0x148] sm:$0xff]  ;;  %v4203_v8 = vld [vmem:[#allocation5 + $0x9c] ss:$24 sps:$4 sm:$0xff]   ;;  %v4201_v10 = vld [vmem:[#allocation5 + $0x98] ss:$24 sps:$4 sm:$0xff]  }
  0x6e   : > { %996 = vmatpush1.bf16.msra.mxu0 %v4152_v11  ;;  %4014 = vmatpush1.bf16.msra.mxu1 %v4152_v11  ;;  %v4198_v7 = vld [vmem:[#allocation5 + $0x70] ss:$24 sps:$4 sm:$0xff]   ;;  %v4206_v9 = vld [vmem:[#allocation5 + $0xa4] ss:$24 sps:$4 sm:$0xff]   ;;  %v4204_v11 = vld [vmem:[#allocation5 + $0xa0] ss:$24 sps:$4 sm:$0xff]   ;;  %v4641_v13 = vpack.c.bf16 %v324_v5, %v322_v4 }
  0x6f   : > { %997 = vmatprep.subr.bf16.mxu0 %v4153_v12  ;;  %3999 = vmatprep.subr.bf16.mxu1 %v4153_v12  ;;  %v4639_v12 = vpack.c.bf16 %v292_v3, %v290_v0  ;;  %v289_v14 = vld [vmem:[%s4587_s11 + $0x40] sm:$0xff]  ;;  %v291_v16 = vld [vmem:[%s4587_s11 + $0x50] sm:$0xff]  ;;  %v300_v47 = vld [vmem:[%s4587_s11 + $0x98] sm:$0xff] }
  0x70   : > { %v321_v17 = vld [vmem:[%s4587_s11 + $0x140] sm:$0xff]  ;;  %v327_v39 = vld [vmem:[%s4587_s11 + $0x170] sm:$0xff]  ;;  %v330_v48 = vld [vmem:[%s4587_s11 + $0x188] sm:$0xff] }
  0x71   : > { %v325_v38 = vld [vmem:[%s4587_s11 + $0x160] sm:$0xff]  ;;  %v4224_v41 = vld [vmem:[#allocation5 + $0x134] ss:$24 sps:$4 sm:$0xff]   ;;  %v332_v49 = vld [vmem:[%s4587_s11 + $0x198] sm:$0xff] }
  0x72   : > { %998 = vmatpush1.bf16.msra.mxu0 %v4155_v18  ;;  %4015 = vmatpush1.bf16.msra.mxu1 %v4155_v18  ;;  %v323_v18 = vld [vmem:[%s4587_s11 + $0x150] sm:$0xff]  ;;  %v4221_v40 = vld [vmem:[#allocation5 + $0x12c] ss:$24 sps:$4 sm:$0xff]   ;;  %v4674_v44 = vpack.c.bf16 %v327_v39, %v325_v38  ;;  %v4228_v59 = vld [vmem:[#allocation5 + $0x160] ss:$24 sps:$4 sm:$0xff]  }
  0x73   : > { %999 = vmatprep.subr.bf16.mxu0 %v4156_v20  ;;  %4000 = vmatprep.subr.bf16.mxu1 %v4156_v20  ;;  %v4209_v20 = vld [vmem:[#allocation5 + $0xcc] ss:$24 sps:$4 sm:$0xff]   ;;  %v4225_v58 = vld [vmem:[#allocation5 + $0x158] ss:$24 sps:$4 sm:$0xff]   ;;  %v4243_v38 = vld [vmem:[#allocation5 + $0x1e8] ss:$24 sps:$4 sm:$0xff]  }
  0x74   : > { %v297_v60 = vld [vmem:[%s4587_s11 + $0x80] sm:$0xff]  ;;  %v299_v61 = vld [vmem:[%s4587_s11 + $0x90] sm:$0xff]  ;;  %v302_v4 = vld [vmem:[%s4587_s11 + $0xa8] sm:$0xff] }
  0x75   : > { %v4233_v0 = vld [vmem:[#allocation5 + $0x18c] ss:$24 sps:$4 sm:$0xff]   ;;  %v4692_v5 = vpack.c.bf16 %v299_v61, %v297_v60  ;;  %v4246_v39 = vld [vmem:[#allocation5 + $0x1f0] ss:$24 sps:$4 sm:$0xff]  }
  0x76   : > { %1000 = vmatpush1.bf16.msra.mxu0 %v4158_v21  ;;  %4016 = vmatpush1.bf16.msra.mxu1 %v4158_v21  ;;  %v4212_v21 = vld [vmem:[#allocation5 + $0xd4] ss:$24 sps:$4 sm:$0xff]  }
  0x77   : > { %1001 = vmatprep.subr.bf16.mxu0 %v4159_v22  ;;  %4001 = vmatprep.subr.bf16.mxu1 %v4159_v22  ;;  %v294_v22 = vld [vmem:[%s4587_s11 + $0x68] sm:$0xff] }
  0x78   : > { %v4236_v3 = vld [vmem:[#allocation5 + $0x194] ss:$24 sps:$4 sm:$0xff]  }
  0x79   : > { %v310_v60 = vld [vmem:[%s4587_s11 + $0xe8] sm:$0xff] }
  0x7a   : > { %1002 = vmatpush1.bf16.msra.mxu0 %v4161_v23  ;;  %4017 = vmatpush1.bf16.msra.mxu1 %v4161_v23  ;;  %v4652_v23 = vpack.c.bf16 %v291_v16, %v289_v14  ;;  %v4239_v14 = vld [vmem:[#allocation5 + $0x1bc] ss:$24 sps:$4 sm:$0xff]  }
  0x7b   : > { %1003 = vmatprep.subr.bf16.mxu0 %v4162_v24  ;;  %4002 = vmatprep.subr.bf16.mxu1 %v4162_v24  ;;  %v4654_v24 = vpack.c.bf16 %v323_v18, %v321_v17  ;;  %v4242_v16 = vld [vmem:[#allocation5 + $0x1c4] ss:$24 sps:$4 sm:$0xff]  }
  0x7e   : > { %1004 = vmatpush1.bf16.msra.mxu0 %v4164_v25  ;;  %4018 = vmatpush1.bf16.msra.mxu1 %v4164_v25  ;;  %v296_v25 = vld [vmem:[%s4587_s11 + $0x78] sm:$0xff] }
  0x7f   : > { %1005 = vmatprep.subr.bf16.mxu0 %v4165_v26  ;;  %4003 = vmatprep.subr.bf16.mxu1 %v4165_v26  ;;  %v326_v26 = vld [vmem:[%s4587_s11 + $0x168] sm:$0xff] }
  0x82   : > { %1006 = vmatpush1.bf16.msra.mxu0 %v4167_v27  ;;  %4019 = vmatpush1.bf16.msra.mxu1 %v4167_v27  ;;  %v328_v27 = vld [vmem:[%s4587_s11 + $0x178] sm:$0xff] }
  0x83   : > { %1007 = vmatprep.subr.bf16.mxu0 %v4168_v28  ;;  %4004 = vmatprep.subr.bf16.mxu1 %v4168_v28  ;;  %v4207_v28 = vld [vmem:[#allocation5 + $0xc8] ss:$24 sps:$4 sm:$0xff]  }
  0x86   : > { %1008 = vmatpush1.bf16.msra.mxu0 %v4170_v29  ;;  %4020 = vmatpush1.bf16.msra.mxu1 %v4170_v29  ;;  %v4210_v29 = vld [vmem:[#allocation5 + $0xd0] ss:$24 sps:$4 sm:$0xff]  }
  0x87   : > { %1009 = vmatprep.subr.bf16.mxu0 %v4171_v30  ;;  %4005 = vmatprep.subr.bf16.mxu1 %v4171_v30  ;;  %v4215_v30 = vld [vmem:[#allocation5 + $0xfc] ss:$24 sps:$4 sm:$0xff]  }
  0x8a   : > { %1010 = vmatpush1.bf16.msra.mxu0 %v4173_v31  ;;  %4021 = vmatpush1.bf16.msra.mxu1 %v4173_v31  ;;  %v4218_v31 = vld [vmem:[#allocation5 + $0x104] ss:$24 sps:$4 sm:$0xff]  }
  0x8b   : > { %1011 = vmatprep.subr.bf16.mxu0 %v4174_v32  ;;  %4006 = vmatprep.subr.bf16.mxu1 %v4174_v32  ;;  %v4213_v32 = vld [vmem:[#allocation5 + $0xf8] ss:$24 sps:$4 sm:$0xff]  }
  0x8e   : > { %1012 = vmatpush1.bf16.msra.mxu0 %v4176_v33  ;;  %4022 = vmatpush1.bf16.msra.mxu1 %v4176_v33  ;;  %v4216_v33 = vld [vmem:[#allocation5 + $0x100] ss:$24 sps:$4 sm:$0xff]  }
  0x8f   : > { %1013 = vmatprep.subr.bf16.mxu0 %v4177_v34  ;;  %4007 = vmatprep.subr.bf16.mxu1 %v4177_v34  ;;  %v4659_v34 = vpack.c.bf16 %v296_v25, %v294_v22  ;;  %v301_v22 = vld [vmem:[%s4587_s11 + $0xa0] sm:$0xff]  ;;  %v303_v25 = vld [vmem:[%s4587_s11 + $0xb0] sm:$0xff] }
  0x92   : > { %1014 = vmatpush1.bf16.msra.mxu0 %v4179_v35  ;;  %4023 = vmatpush1.bf16.msra.mxu1 %v4179_v35  ;;  %v4661_v35 = vpack.c.bf16 %v328_v27, %v326_v26  ;;  %v333_v26 = vld [vmem:[%s4587_s11 + $0x1a0] sm:$0xff]  ;;  %v335_v27 = vld [vmem:[%s4587_s11 + $0x1b0] sm:$0xff] }
  0x93   : > { %1015 = vmatprep.subr.bf16.mxu0 %v4180_v36  ;;  %4008 = vmatprep.subr.bf16.mxu1 %v4180_v36  ;;  %v293_v36 = vld [vmem:[%s4587_s11 + $0x60] sm:$0xff] }
  0x96   : > { %1016 = vmatpush1.bf16.msra.mxu0 %v4182_v37  ;;  %4024 = vmatpush1.bf16.msra.mxu1 %v4182_v37  ;;  %v295_v37 = vld [vmem:[%s4587_s11 + $0x70] sm:$0xff] }
  0x97   : > { %1178 = vmatprep.subr.bf16.mxu1 %v4185_v42  ;;  %1371 = vmatprep.subr.bf16.mxu0 %v4188_v43  ;;  %v298_v42 = vld [vmem:[%s4587_s11 + $0x88] sm:$0xff]  ;;  %v4672_v43 = vpack.c.bf16 %v295_v37, %v293_v36  ;;  %v340_v37 = vld [vmem:[%s4587_s11 + $0x1d8] sm:$0xff] }
  0x98   : > { %v338_v36 = vld [vmem:[%s4587_s11 + $0x1c8] sm:$0xff] }
  0x99   : > { %1018 = vmatmul.mubr.bf16.vlgmr.msra.gmra.mrb[0].mxu0 %v4612_v45  ;;  %1098 = vmatmul.mubr.bf16.vlgmr.msra.gmra.mrb[0].mxu1 %v4614_v46 }
  0x9a   : > { %1179 = vmatpush1.bf16.msra.mxu1 %v4183_v50  ;;  %1372 = vmatpush1.bf16.msra.mxu0 %v4186_v51  ;;  %v4219_v50 = vld [vmem:[#allocation5 + $0x128] ss:$24 sps:$4 sm:$0xff]  }
  0x9b   : > { %1180 = vmatprep.subr.bf16.mxu1 %v4191_v52  ;;  %1373 = vmatprep.subr.bf16.mxu0 %v4194_v53  ;;  %v4222_v51 = vld [vmem:[#allocation5 + $0x130] ss:$24 sps:$4 sm:$0xff]   ;;  %v4227_v52 = vld [vmem:[#allocation5 + $0x15c] ss:$24 sps:$4 sm:$0xff]  }
  0x9c   : > { %1027 = vmatprep.mubr.bf16.mxu0 %v4619_v56  ;;  %1107 = vmatprep.mubr.bf16.mxu1 %v4621_v57  ;;  %v4230_v53 = vld [vmem:[#allocation5 + $0x164] ss:$24 sps:$4 sm:$0xff]  }
  0x9e   : > { %1181 = vmatpush1.bf16.msra.mxu1 %v4189_v54  ;;  %1374 = vmatpush1.bf16.msra.mxu0 %v4192_v55  ;;  %v4679_v54 = vpack.c.bf16 %v300_v47, %v298_v42  ;;  %v4681_v55 = vpack.c.bf16 %v332_v49, %v330_v48  ;;  %v4721_v47 = vpack.c.bf16 %v340_v37, %v338_v36  ;;  %v4249_v48 = vld [vmem:[#allocation5 + $0x218] ss:$24 sps:$4 sm:$0xff]   ;;  %v4275_v36 = vld [vmem:[#allocation5 + $0x2dc] ss:$24 sps:$4 sm:$0xff]  }
  0x9f   : > { %1182 = vmatprep.subr.bf16.mxu1 %v4197_v62  ;;  %1375 = vmatprep.subr.bf16.mxu0 %v4200_v63  ;;  %v329_v62 = vld [vmem:[%s4587_s11 + $0x180] sm:$0xff]  ;;  %v331_v63 = vld [vmem:[%s4587_s11 + $0x190] sm:$0xff] }
  0xa0   : > { %v4252_v49 = vld [vmem:[#allocation5 + $0x220] ss:$24 sps:$4 sm:$0xff]   ;;  %v4278_v37 = vld [vmem:[#allocation5 + $0x2e4] ss:$24 sps:$4 sm:$0xff]  }
  0xa1   : > { %1028 = vmatmul.mubr.bf16.gmra.mrb[4].mxu0 %v4632_v1  ;;  %1108 = vmatmul.mubr.bf16.gmra.mrb[4].mxu1 %v4634_v2 }
  0xa2   : > { %1183 = vmatpush1.bf16.msra.mxu1 %v4195_v6  ;;  %1376 = vmatpush1.bf16.msra.mxu0 %v4198_v7  ;;  %v4694_v6 = vpack.c.bf16 %v331_v63, %v329_v62  ;;  %v304_v7 = vld [vmem:[%s4587_s11 + $0xb8] sm:$0xff] }
  0xa3   : > { %1184 = vmatprep.subr.bf16.mxu1 %v4203_v8  ;;  %1377 = vmatprep.subr.bf16.mxu0 %v4206_v9  ;;  %v334_v8 = vld [vmem:[%s4587_s11 + $0x1a8] sm:$0xff]  ;;  %v336_v9 = vld [vmem:[%s4587_s11 + $0x1b8] sm:$0xff]  ;;  %v4699_v17 = vpack.c.bf16 %v304_v7, %v302_v4 }
  0xa4   : > { %1037 = vmatprep.mubr.bf16.mxu0 %v4639_v12  ;;  %1117 = vmatprep.mubr.bf16.mxu1 %v4641_v13  ;;  %v4701_v18 = vpack.c.bf16 %v336_v9, %v334_v8  ;;  %v312_v63 = vld [vmem:[%s4587_s11 + $0xf8] sm:$0xff]  ;;  %v4255_v4 = vld [vmem:[#allocation5 + $0x248] ss:$24 sps:$4 sm:$0xff]  }
  0xa5   : > { %v4258_v7 = vld [vmem:[#allocation5 + $0x250] ss:$24 sps:$4 sm:$0xff]   ;;  %v4263_v8 = vld [vmem:[#allocation5 + $0x27c] ss:$24 sps:$4 sm:$0xff]  }
  0xa6   : > { %1185 = vmatpush1.bf16.msra.mxu1 %v4201_v10  ;;  %1378 = vmatpush1.bf16.msra.mxu0 %v4204_v11  ;;  %v4231_v10 = vld [vmem:[#allocation5 + $0x188] ss:$24 sps:$4 sm:$0xff]   ;;  %v4266_v9 = vld [vmem:[#allocation5 + $0x284] ss:$24 sps:$4 sm:$0xff]  }
  0xa7   : > { %1186 = vmatprep.subr.bf16.mxu1 %v4209_v20  ;;  %1379 = vmatprep.subr.bf16.mxu0 %v4212_v21  ;;  %v4234_v11 = vld [vmem:[#allocation5 + $0x190] ss:$24 sps:$4 sm:$0xff]   ;;  %v4240_v21 = vld [vmem:[#allocation5 + $0x1c0] ss:$24 sps:$4 sm:$0xff]  }
  0xa8   : > { %v4237_v20 = vld [vmem:[#allocation5 + $0x1b8] ss:$24 sps:$4 sm:$0xff]  }
  0xa9   : > { %1038 = vmatmul.mubr.bf16.gmra.mrb[8].mxu0 %v4652_v23  ;;  %1118 = vmatmul.mubr.bf16.gmra.mrb[8].mxu1 %v4654_v24 }
  0xaa   : > { %1187 = vmatpush1.bf16.msra.mxu1 %v4207_v28  ;;  %1380 = vmatpush1.bf16.msra.mxu0 %v4210_v29  ;;  %v4245_v28 = vld [vmem:[#allocation5 + $0x1ec] ss:$24 sps:$4 sm:$0xff]  }
  0xab   : > { %1188 = vmatprep.subr.bf16.mxu1 %v4215_v30  ;;  %1381 = vmatprep.subr.bf16.mxu0 %v4218_v31  ;;  %v4248_v29 = vld [vmem:[#allocation5 + $0x1f4] ss:$24 sps:$4 sm:$0xff]   ;;  %v4712_v31 = vpack.c.bf16 %v303_v25, %v301_v22  ;;  %v341_v22 = vld [vmem:[%s4587_s11 + $0x1e0] sm:$0xff] }
  0xac   : > { %1047 = vmatprep.mubr.bf16.mxu0 %v4659_v34  ;;  %1127 = vmatprep.mubr.bf16.mxu1 %v4661_v35  ;;  %v306_v30 = vld [vmem:[%s4587_s11 + $0xc8] sm:$0xff]  ;;  %v343_v25 = vld [vmem:[%s4587_s11 + $0x1f0] sm:$0xff] }
  0xae   : > { %1189 = vmatpush1.bf16.msra.mxu1 %v4213_v32  ;;  %1382 = vmatpush1.bf16.msra.mxu0 %v4216_v33  ;;  %v4714_v32 = vpack.c.bf16 %v335_v27, %v333_v26  ;;  %v308_v33 = vld [vmem:[%s4587_s11 + $0xd8] sm:$0xff]  ;;  %v4269_v26 = vld [vmem:[#allocation5 + $0x2ac] ss:$24 sps:$4 sm:$0xff]  }
  0xaf   : > { %1190 = vmatprep.subr.bf16.mxu1 %v4221_v40  ;;  %1383 = vmatprep.subr.bf16.mxu0 %v4224_v41  ;;  %v4251_v40 = vld [vmem:[#allocation5 + $0x21c] ss:$24 sps:$4 sm:$0xff]   ;;  %v4719_v42 = vpack.c.bf16 %v308_v33, %v306_v30  ;;  %v4267_v30 = vld [vmem:[#allocation5 + $0x2a8] ss:$24 sps:$4 sm:$0xff]  }
  0xb0   : > { %v4254_v41 = vld [vmem:[#allocation5 + $0x224] ss:$24 sps:$4 sm:$0xff]   ;;  %v4272_v27 = vld [vmem:[#allocation5 + $0x2b4] ss:$24 sps:$4 sm:$0xff]   ;;  %v4270_v33 = vld [vmem:[#allocation5 + $0x2b0] ss:$24 sps:$4 sm:$0xff]  }
  0xb1   : > { %1048 = vmatmul.mubr.bf16.gmra.mrb[12].mxu0 %v4672_v43  ;;  %1128 = vmatmul.mubr.bf16.gmra.mrb[12].mxu1 %v4674_v44 }
  0xb2   : > { %1191 = vmatpush1.bf16.msra.mxu1 %v4219_v50  ;;  %1384 = vmatpush1.bf16.msra.mxu0 %v4222_v51  ;;  %v305_v50 = vld [vmem:[%s4587_s11 + $0xc0] sm:$0xff]  ;;  %v307_v51 = vld [vmem:[%s4587_s11 + $0xd0] sm:$0xff] }
  0xb3   : > { %1192 = vmatprep.subr.bf16.mxu1 %v4227_v52  ;;  %1385 = vmatprep.subr.bf16.mxu0 %v4230_v53  ;;  %v337_v52 = vld [vmem:[%s4587_s11 + $0x1c0] sm:$0xff]  ;;  %v339_v53 = vld [vmem:[%s4587_s11 + $0x1d0] sm:$0xff]  ;;  %v4732_v61 = vpack.c.bf16 %v307_v51, %v305_v50 }
  0xb4   : > { %1057 = vmatprep.mubr.bf16.mxu0 %v4679_v54  ;;  %1137 = vmatprep.mubr.bf16.mxu1 %v4681_v55  ;;  %v4734_v62 = vpack.c.bf16 %v339_v53, %v337_v52 }
  0xb6   : > { %1193 = vmatpush1.bf16.msra.mxu1 %v4225_v58  ;;  %1386 = vmatpush1.bf16.msra.mxu0 %v4228_v59  ;;  %v4257_v58 = vld [vmem:[#allocation5 + $0x24c] ss:$24 sps:$4 sm:$0xff]  }
  0xb7   : > { %1194 = vmatprep.subr.bf16.mxu1 %v4233_v0  ;;  %1387 = vmatprep.subr.bf16.mxu0 %v4236_v3  ;;  %v4260_v59 = vld [vmem:[#allocation5 + $0x254] ss:$24 sps:$4 sm:$0xff]   ;;  %v344_v3 = vld [vmem:[%s4587_s11 + $0x1f8] sm:$0xff] }
  0xb8   : > { %v342_v0 = vld [vmem:[%s4587_s11 + $0x1e8] sm:$0xff] }
  0xb9   : > { %1058 = vmatmul.mubr.bf16.gmra.mrb[16].mxu0 %v4692_v5  ;;  %1138 = vmatmul.mubr.bf16.gmra.mrb[16].mxu1 %v4694_v6 }
  0xba   : > { %1195 = vmatpush1.bf16.msra.mxu1 %v4231_v10  ;;  %1388 = vmatpush1.bf16.msra.mxu0 %v4234_v11  ;;  %v4739_v10 = vpack.c.bf16 %v312_v63, %v310_v60  ;;  %v4741_v11 = vpack.c.bf16 %v344_v3, %v342_v0 }
  0xbb   : > { %1196 = vmatprep.subr.bf16.mxu1 %v4239_v14  ;;  %1389 = vmatprep.subr.bf16.mxu0 %v4242_v16  ;;  %v4261_v14 = vld [vmem:[#allocation5 + $0x278] ss:$24 sps:$4 sm:$0xff]  }
  0xbc   : > { %1067 = vmatprep.mubr.bf16.mxu0 %v4699_v17  ;;  %1147 = vmatprep.mubr.bf16.mxu1 %v4701_v18  ;;  %v4264_v16 = vld [vmem:[#allocation5 + $0x280] ss:$24 sps:$4 sm:$0xff]  }
  0xbe   : > { %1197 = vmatpush1.bf16.msra.mxu1 %v4237_v20  ;;  %1390 = vmatpush1.bf16.msra.mxu0 %v4240_v21  ;;  %v309_v20 = vld [vmem:[%s4587_s11 + $0xe0] sm:$0xff]  ;;  %v311_v21 = vld [vmem:[%s4587_s11 + $0xf0] sm:$0xff] }
  0xbf   : > { %1198 = vmatprep.subr.bf16.mxu1 %v4245_v28  ;;  %1391 = vmatprep.subr.bf16.mxu0 %v4248_v29  ;;  %v359_v28 = vpack.c.bf16 %v311_v21, %v309_v20  ;;  %v4751_v29 = vpack.c.bf16 %v343_v25, %v341_v22 }
  0xc1   : > { %1068 = vmatmul.mubr.bf16.gmra.mrb[20].mxu0 %v4712_v31  ;;  %1148 = vmatmul.mubr.bf16.gmra.mrb[20].mxu1 %v4714_v32 }
  0xc2   : > { %1199 = vmatpush1.bf16.msra.mxu1 %v4243_v38  ;;  %1392 = vmatpush1.bf16.msra.mxu0 %v4246_v39  ;;  %v4273_v38 = vld [vmem:[#allocation5 + $0x2d8] ss:$24 sps:$4 sm:$0xff]  }
  0xc3   : > { %1200 = vmatprep.subr.bf16.mxu1 %v4251_v40  ;;  %1393 = vmatprep.subr.bf16.mxu0 %v4254_v41  ;;  %v4276_v39 = vld [vmem:[#allocation5 + $0x2e0] ss:$24 sps:$4 sm:$0xff]  }
  0xc4   : > { %1077 = vmatprep.mubr.bf16.mxu0 %v4719_v42  ;;  %1157 = vmatprep.mubr.bf16.mxu1 %v4721_v47 }
  0xc6   : > { %1201 = vmatpush1.bf16.msra.mxu1 %v4249_v48  ;;  %1394 = vmatpush1.bf16.msra.mxu0 %v4252_v49 }
  0xc7   : > { %1202 = vmatprep.subr.bf16.mxu1 %v4257_v58  ;;  %1395 = vmatprep.subr.bf16.mxu0 %v4260_v59 }
  0xc9   : > { %1078 = vmatmul.mubr.bf16.gmra.mrb[24].mxu0 %v4732_v61  ;;  %1158 = vmatmul.mubr.bf16.gmra.mrb[24].mxu1 %v4734_v62 }
  0xca   : > { %1203 = vmatpush1.bf16.msra.mxu1 %v4255_v4  ;;  %1396 = vmatpush1.bf16.msra.mxu0 %v4258_v7 }
  0xcb   : > { %1204 = vmatprep.subr.bf16.mxu1 %v4263_v8  ;;  %1397 = vmatprep.subr.bf16.mxu0 %v4266_v9 }
  0xcc   : > { %1087 = vmatprep.mubr.bf16.mxu0 %v4739_v10  ;;  %1167 = vmatprep.mubr.bf16.mxu1 %v4741_v11 }
  0xce   : > { %1205 = vmatpush1.bf16.msra.mxu1 %v4261_v14  ;;  %1398 = vmatpush1.bf16.msra.mxu0 %v4264_v16 }
  0xcf   : > { %1206 = vmatprep.subr.bf16.mxu1 %v4269_v26  ;;  %1399 = vmatprep.subr.bf16.mxu0 %v4272_v27 }
  0xd1   : > { %1088 = vmatmul.mubr.bf16.gmra.mrb[28].mxu0 %v359_v28  ;;  %1168 = vmatmul.mubr.bf16.gmra.mrb[28].mxu1 %v4751_v29 }
  0xd2   : > { %1207 = vmatpush1.bf16.msra.mxu1 %v4267_v30  ;;  %1400 = vmatpush1.bf16.msra.mxu0 %v4270_v33 }
  0xd3   : > { %1208 = vmatprep.subr.bf16.mxu1 %v4275_v36  ;;  %1401 = vmatprep.subr.bf16.mxu0 %v4278_v37 }
  0xd4   : > { %1210 = vmatprep.mubr.bf16.mxu1 %v4599_v15  ;;  %1403 = vmatprep.mubr.bf16.mxu0 %v4599_v15  ;;  %v475_v15 = vlaneseq }
  0xd6   : > { %1209 = vmatpush1.bf16.msra.mxu1 %v4273_v38  ;;  %1402 = vmatpush1.bf16.msra.mxu0 %v4276_v39 }
  0xd9   : > { %1211 = vmatmul.mubr.bf16.vlgmr.msra.gmra.mrb[32].mxu1 %v4612_v45  ;;  %1404 = vmatmul.mubr.bf16.vlgmr.msra.gmra.mrb[32].mxu0 %v4612_v45 }
  0xda   : > { %1220 = vmatprep.mubr.bf16.mxu1 %v4619_v56  ;;  %1413 = vmatprep.mubr.bf16.mxu0 %v4619_v56 }
  0xe1   : > { %1221 = vmatmul.mubr.bf16.gmra.mrb[36].mxu1 %v4632_v1  ;;  %1414 = vmatmul.mubr.bf16.gmra.mrb[36].mxu0 %v4632_v1 }
  0xe2   : > { %1230 = vmatprep.mubr.bf16.mxu1 %v4639_v12  ;;  %1423 = vmatprep.mubr.bf16.mxu0 %v4639_v12 }
  0xe9   : > { %1231 = vmatmul.mubr.bf16.gmra.mrb[40].mxu1 %v4652_v23  ;;  %1424 = vmatmul.mubr.bf16.gmra.mrb[40].mxu0 %v4652_v23 }
  0xea   : > { %1240 = vmatprep.mubr.bf16.mxu1 %v4659_v34  ;;  %1433 = vmatprep.mubr.bf16.mxu0 %v4659_v34 }
  0xf1   : > { %1241 = vmatmul.mubr.bf16.gmra.mrb[44].mxu1 %v4672_v43  ;;  %1434 = vmatmul.mubr.bf16.gmra.mrb[44].mxu0 %v4672_v43 }
  0xf2   : > { %1250 = vmatprep.mubr.bf16.mxu1 %v4679_v54  ;;  %1443 = vmatprep.mubr.bf16.mxu0 %v4679_v54 }
  0xf9   : > { %1251 = vmatmul.mubr.bf16.gmra.mrb[48].mxu1 %v4692_v5  ;;  %1444 = vmatmul.mubr.bf16.gmra.mrb[48].mxu0 %v4692_v5 }
  0xfa   : > { %1260 = vmatprep.mubr.bf16.mxu1 %v4699_v17  ;;  %1453 = vmatprep.mubr.bf16.mxu0 %v4699_v17 }
 0x101   : > { %1261 = vmatmul.mubr.bf16.gmra.mrb[52].mxu1 %v4712_v31  ;;  %1454 = vmatmul.mubr.bf16.gmra.mrb[52].mxu0 %v4712_v31 }
 0x102   : > { %1270 = vmatprep.mubr.bf16.mxu1 %v4719_v42  ;;  %1463 = vmatprep.mubr.bf16.mxu0 %v4719_v42 }
 0x109   : > { %1271 = vmatmul.mubr.bf16.gmra.mrb[56].mxu1 %v4732_v61  ;;  %1464 = vmatmul.mubr.bf16.gmra.mrb[56].mxu0 %v4732_v61 }
 0x10a   : > { %1280 = vmatprep.mubr.bf16.mxu1 %v4739_v10  ;;  %1473 = vmatprep.mubr.bf16.mxu0 %v4739_v10 }
 0x111   : > { %1281 = vmatmul.mubr.bf16.gmra.mrb[60].mxu1 %v359_v28  ;;  %1474 = vmatmul.mubr.bf16.gmra.mrb[60].mxu0 %v359_v28 }
 0x112   : > { %1290 = vmatprep.mubr.bf16.mxu1 %v4603_v19  ;;  %1483 = vmatprep.mubr.bf16.mxu0 %v4603_v19  ;;  %v4816_v19 = vshrl.u32 %v475_v15, 7 }
 0x114   : > { %v477_v45 = vsub.s32 0, %v4816_v19  ;;  %v481_v56 = vsub.s32 1, %v4816_v19 }
 0x119   : > { %1291 = vmatmul.mubr.bf16.gmra.mrb[64].mxu1 %v4614_v46  ;;  %1484 = vmatmul.mubr.bf16.gmra.mrb[64].mxu0 %v4614_v46  ;;  %v4822_v46 = vld [vmem:[%s5237_s2] sm:$0x3f] }
 0x11a   : > { %1300 = vmatprep.mubr.bf16.mxu1 %v4621_v57  ;;  %1493 = vmatprep.mubr.bf16.mxu0 %v4621_v57  ;;  %v4826_v57 = vrot.slane %v4822_v46, %v477_v45  ;;  %v4829_v12 = vrot.slane %v4822_v46, %v481_v56 }
 0x121   : > { %1301 = vmatmul.mubr.bf16.gmra.mrb[68].mxu1 %v4634_v2  ;;  %1494 = vmatmul.mubr.bf16.gmra.mrb[68].mxu0 %v4634_v2 }
 0x122   : > { %1310 = vmatprep.mubr.bf16.mxu1 %v4641_v13  ;;  %1503 = vmatprep.mubr.bf16.mxu0 %v4641_v13 }
 0x129   : > { %1311 = vmatmul.mubr.bf16.gmra.mrb[72].mxu1 %v4654_v24  ;;  %1504 = vmatmul.mubr.bf16.gmra.mrb[72].mxu0 %v4654_v24 }
 0x12a   : > { %1320 = vmatprep.mubr.bf16.mxu1 %v4661_v35  ;;  %1513 = vmatprep.mubr.bf16.mxu0 %v4661_v35 }
 0x131   : > { %1321 = vmatmul.mubr.bf16.gmra.mrb[76].mxu1 %v4674_v44  ;;  %1514 = vmatmul.mubr.bf16.gmra.mrb[76].mxu0 %v4674_v44 }
 0x132   : > { %1330 = vmatprep.mubr.bf16.mxu1 %v4681_v55  ;;  %1523 = vmatprep.mubr.bf16.mxu0 %v4681_v55 }
 0x139   : > { %1331 = vmatmul.mubr.bf16.gmra.mrb[80].mxu1 %v4694_v6  ;;  %1524 = vmatmul.mubr.bf16.gmra.mrb[80].mxu0 %v4694_v6 }
 0x13a   : > { %1340 = vmatprep.mubr.bf16.mxu1 %v4701_v18  ;;  %1533 = vmatprep.mubr.bf16.mxu0 %v4701_v18 }
 0x141   : > { %1341 = vmatmul.mubr.bf16.gmra.mrb[84].mxu1 %v4714_v32  ;;  %1534 = vmatmul.mubr.bf16.gmra.mrb[84].mxu0 %v4714_v32 }
 0x142   : > { %1350 = vmatprep.mubr.bf16.mxu1 %v4721_v47  ;;  %1543 = vmatprep.mubr.bf16.mxu0 %v4721_v47 }
 0x149   : > { %1351 = vmatmul.mubr.bf16.gmra.mrb[88].mxu1 %v4734_v62  ;;  %1544 = vmatmul.mubr.bf16.gmra.mrb[88].mxu0 %v4734_v62 }
 0x14a   : > { %1360 = vmatprep.mubr.bf16.mxu1 %v4741_v11  ;;  %1553 = vmatprep.mubr.bf16.mxu0 %v4741_v11 }
 0x151   : > { %1361 = vmatmul.mubr.bf16.gmra.mrb[92].mxu1 %v4751_v29  ;;  %1554 = vmatmul.mubr.bf16.gmra.mrb[92].mxu0 %v4751_v29 }
 0x16c   : > { %v1019_v1 = vpop.f32.mrb[0].mxu0  ;;  %v1099_v2 = vpop.f32.mrb[0].mxu1 }
 0x16d   : > { %v1021_v13 = vpop.f32.mrb[1].mxu0  ;;  %v1101_v23 = vpop.f32.mrb[1].mxu1  ;;  %v1020_v35 = vadd.f32 %v1019_v1, %v4826_v57  ;;  %v1100_v43 = vadd.f32 %v1099_v2, %v4826_v57 }
 0x16e   : > { %v1023_v24 = vpop.f32.mrb[2].mxu0  ;;  %v1103_v34 = vpop.f32.mrb[2].mxu1  ;;  %v1022_v6 = vadd.f32 %v1021_v13, %v4829_v12  ;;  %v1102_v17 = vadd.f32 %v1101_v23, %v4829_v12 }
 0x16f   : > { %v1024_v44 = vadd.f32 %v1023_v24, %v4826_v57  ;;  %v1104_v54 = vadd.f32 %v1103_v34, %v4826_v57  ;;  %v1025_v55 = vpop.f32.mrb[3].mxu0  ;;  %v1105_v5 = vpop.f32.mrb[3].mxu1 }
 0x170   : > { %v1026_v18 = vadd.f32 %v1025_v55, %v4829_v12  ;;  %v1106_v31 = vadd.f32 %v1105_v5, %v4829_v12 }
 0x171   : > { %v3423_v32 = vpack.c.bf16 %v1024_v44, %v1020_v35  ;;  %v3463_v40 = vpack.c.bf16 %v1104_v54, %v1100_v43 }
 0x172   : > { %v3663_v41 = vpack.c.bf16 %v1026_v18, %v1022_v6  ;;  %v3703_v42 = vpack.c.bf16 %v1106_v31, %v1102_v17 }
 0x173   : > { %3424 = vst [vmem:[%s4843_s6] sm:$0xff] %v3423_v32   ;;  %3907 = vst [vmem:[%s4843_s6 + $0x40] sm:$0xff] %v3463_v40  }
 0x174   : > { %3945 = vst [vmem:[%s4843_s6 + $0x80] sm:$0xff] %v3663_v41   ;;  %3953 = vst [vmem:[%s4843_s6 + $0xc0] sm:$0xff] %v3703_v42   ;;  %v1029_v47 = vpop.f32.mrb[4].mxu0  ;;  %v1109_v48 = vpop.f32.mrb[4].mxu1 }
 0x175   : > { %v1031_v49 = vpop.f32.mrb[5].mxu0  ;;  %v1111_v50 = vpop.f32.mrb[5].mxu1  ;;  %v1030_v53 = vadd.f32 %v1029_v47, %v4826_v57  ;;  %v1110_v58 = vadd.f32 %v1109_v48, %v4826_v57 }
 0x176   : > { %v1033_v51 = vpop.f32.mrb[6].mxu0  ;;  %v1113_v52 = vpop.f32.mrb[6].mxu1  ;;  %v1032_v63 = vadd.f32 %v1031_v49, %v4829_v12  ;;  %v1112_v0 = vadd.f32 %v1111_v50, %v4829_v12 }
 0x177   : > { %v1034_v59 = vadd.f32 %v1033_v51, %v4826_v57  ;;  %v1114_v60 = vadd.f32 %v1113_v52, %v4826_v57  ;;  %v1035_v61 = vpop.f32.mrb[7].mxu0  ;;  %v1115_v62 = vpop.f32.mrb[7].mxu1 }
 0x178   : > { %v1036_v3 = vadd.f32 %v1035_v61, %v4829_v12  ;;  %v1116_v4 = vadd.f32 %v1115_v62, %v4829_v12 }
 0x179   : > { %v3428_v7 = vpack.c.bf16 %v1034_v59, %v1030_v53  ;;  %v3468_v8 = vpack.c.bf16 %v1114_v60, %v1110_v58 }
 0x17a   : > { %v3668_v9 = vpack.c.bf16 %v1036_v3, %v1032_v63  ;;  %v3708_v10 = vpack.c.bf16 %v1116_v4, %v1112_v0 }
 0x17b   : > { %3900 = vst [vmem:[%s4843_s6 + $0x8] sm:$0xff] %v3428_v7   ;;  %3908 = vst [vmem:[%s4843_s6 + $0x48] sm:$0xff] %v3468_v8  }
 0x17c   : > { %3946 = vst [vmem:[%s4843_s6 + $0x88] sm:$0xff] %v3668_v9   ;;  %3954 = vst [vmem:[%s4843_s6 + $0xc8] sm:$0xff] %v3708_v10   ;;  %v1039_v11 = vpop.f32.mrb[8].mxu0  ;;  %v1119_v14 = vpop.f32.mrb[8].mxu1 }
 0x17d   : > { %v1041_v16 = vpop.f32.mrb[9].mxu0  ;;  %v1121_v20 = vpop.f32.mrb[9].mxu1  ;;  %v1040_v25 = vadd.f32 %v1039_v11, %v4826_v57  ;;  %v1120_v26 = vadd.f32 %v1119_v14, %v4826_v57 }
 0x17e   : > { %v1043_v21 = vpop.f32.mrb[10].mxu0  ;;  %v1123_v22 = vpop.f32.mrb[10].mxu1  ;;  %v1042_v33 = vadd.f32 %v1041_v16, %v4829_v12  ;;  %v1122_v36 = vadd.f32 %v1121_v20, %v4829_v12 }
 0x17f   : > { %v1044_v27 = vadd.f32 %v1043_v21, %v4826_v57  ;;  %v1124_v28 = vadd.f32 %v1123_v22, %v4826_v57  ;;  %v1045_v29 = vpop.f32.mrb[11].mxu0  ;;  %v1125_v30 = vpop.f32.mrb[11].mxu1 }
 0x180   : > { %v1046_v37 = vadd.f32 %v1045_v29, %v4829_v12  ;;  %v1126_v38 = vadd.f32 %v1125_v30, %v4829_v12 }
 0x181   : > { %v3433_v39 = vpack.c.bf16 %v1044_v27, %v1040_v25  ;;  %v3473_v15 = vpack.c.bf16 %v1124_v28, %v1120_v26 }
 0x182   : > { %v3673_v45 = vpack.c.bf16 %v1046_v37, %v1042_v33  ;;  %v3713_v56 = vpack.c.bf16 %v1126_v38, %v1122_v36 }
 0x183   : > { %3901 = vst [vmem:[%s4843_s6 + $0x10] sm:$0xff] %v3433_v39   ;;  %3909 = vst [vmem:[%s4843_s6 + $0x50] sm:$0xff] %v3473_v15  }
 0x184   : > { %3947 = vst [vmem:[%s4843_s6 + $0x90] sm:$0xff] %v3673_v45   ;;  %3955 = vst [vmem:[%s4843_s6 + $0xd0] sm:$0xff] %v3713_v56   ;;  %v1049_v1 = vpop.f32.mrb[12].mxu0  ;;  %v1129_v2 = vpop.f32.mrb[12].mxu1 }
 0x185   : > { %v1051_v13 = vpop.f32.mrb[13].mxu0  ;;  %v1131_v23 = vpop.f32.mrb[13].mxu1  ;;  %v1050_v35 = vadd.f32 %v1049_v1, %v4826_v57  ;;  %v1130_v43 = vadd.f32 %v1129_v2, %v4826_v57 }
 0x186   : > { %v1053_v24 = vpop.f32.mrb[14].mxu0  ;;  %v1133_v34 = vpop.f32.mrb[14].mxu1  ;;  %v1052_v6 = vadd.f32 %v1051_v13, %v4829_v12  ;;  %v1132_v17 = vadd.f32 %v1131_v23, %v4829_v12 }
 0x187   : > { %v1054_v44 = vadd.f32 %v1053_v24, %v4826_v57  ;;  %v1134_v54 = vadd.f32 %v1133_v34, %v4826_v57  ;;  %v1055_v55 = vpop.f32.mrb[15].mxu0  ;;  %v1135_v5 = vpop.f32.mrb[15].mxu1 }
 0x188   : > { %v1056_v18 = vadd.f32 %v1055_v55, %v4829_v12  ;;  %v1136_v31 = vadd.f32 %v1135_v5, %v4829_v12 }
 0x189   : > { %v3438_v32 = vpack.c.bf16 %v1054_v44, %v1050_v35  ;;  %v3478_v40 = vpack.c.bf16 %v1134_v54, %v1130_v43 }
 0x18a   : > { %v3678_v41 = vpack.c.bf16 %v1056_v18, %v1052_v6  ;;  %v3718_v42 = vpack.c.bf16 %v1136_v31, %v1132_v17 }
 0x18b   : > { %3902 = vst [vmem:[%s4843_s6 + $0x18] sm:$0xff] %v3438_v32   ;;  %3910 = vst [vmem:[%s4843_s6 + $0x58] sm:$0xff] %v3478_v40  }
 0x18c   : > { %3948 = vst [vmem:[%s4843_s6 + $0x98] sm:$0xff] %v3678_v41   ;;  %3956 = vst [vmem:[%s4843_s6 + $0xd8] sm:$0xff] %v3718_v42   ;;  %v1059_v47 = vpop.f32.mrb[16].mxu0  ;;  %v1139_v48 = vpop.f32.mrb[16].mxu1 }
 0x18d   : > { %v1061_v49 = vpop.f32.mrb[17].mxu0  ;;  %v1141_v50 = vpop.f32.mrb[17].mxu1  ;;  %v1060_v53 = vadd.f32 %v1059_v47, %v4826_v57  ;;  %v1140_v58 = vadd.f32 %v1139_v48, %v4826_v57 }
 0x18e   : > { %v1063_v51 = vpop.f32.mrb[18].mxu0  ;;  %v1143_v52 = vpop.f32.mrb[18].mxu1  ;;  %v1062_v63 = vadd.f32 %v1061_v49, %v4829_v12  ;;  %v1142_v0 = vadd.f32 %v1141_v50, %v4829_v12 }
 0x18f   : > { %v1064_v59 = vadd.f32 %v1063_v51, %v4826_v57  ;;  %v1144_v60 = vadd.f32 %v1143_v52, %v4826_v57  ;;  %v1065_v61 = vpop.f32.mrb[19].mxu0  ;;  %v1145_v62 = vpop.f32.mrb[19].mxu1 }
 0x190   : > { %v1066_v3 = vadd.f32 %v1065_v61, %v4829_v12  ;;  %v1146_v4 = vadd.f32 %v1145_v62, %v4829_v12 }
 0x191   : > { %v3443_v7 = vpack.c.bf16 %v1064_v59, %v1060_v53  ;;  %v3483_v8 = vpack.c.bf16 %v1144_v60, %v1140_v58  ;;  %v485_v53 = vsub.s32 2, %v4816_v19  ;;  %v493_v58 = vsub.s32 4, %v4816_v19 }
 0x192   : > { %v3683_v9 = vpack.c.bf16 %v1066_v3, %v1062_v63  ;;  %v3723_v10 = vpack.c.bf16 %v1146_v4, %v1142_v0  ;;  %v489_v59 = vsub.s32 3, %v4816_v19  ;;  %v497_v60 = vsub.s32 5, %v4816_v19 }
 0x193   : > { %3903 = vst [vmem:[%s4843_s6 + $0x20] sm:$0xff] %v3443_v7   ;;  %3911 = vst [vmem:[%s4843_s6 + $0x60] sm:$0xff] %v3483_v8  }
 0x194   : > { %3949 = vst [vmem:[%s4843_s6 + $0xa0] sm:$0xff] %v3683_v9   ;;  %3957 = vst [vmem:[%s4843_s6 + $0xe0] sm:$0xff] %v3723_v10   ;;  %v1069_v11 = vpop.f32.mrb[20].mxu0  ;;  %v1149_v14 = vpop.f32.mrb[20].mxu1 }
 0x195   : > { %v1071_v16 = vpop.f32.mrb[21].mxu0  ;;  %v1151_v20 = vpop.f32.mrb[21].mxu1  ;;  %v1070_v25 = vadd.f32 %v1069_v11, %v4826_v57  ;;  %v1150_v26 = vadd.f32 %v1149_v14, %v4826_v57 }
 0x196   : > { %v1073_v21 = vpop.f32.mrb[22].mxu0  ;;  %v1153_v22 = vpop.f32.mrb[22].mxu1  ;;  %v1072_v33 = vadd.f32 %v1071_v16, %v4829_v12  ;;  %v1152_v36 = vadd.f32 %v1151_v20, %v4829_v12  ;;  %v4939_v20 = vrot.slane %v4822_v46, %v493_v58 }
 0x197   : > { %v1074_v27 = vadd.f32 %v1073_v21, %v4826_v57  ;;  %v1154_v28 = vadd.f32 %v1153_v22, %v4826_v57  ;;  %v1075_v29 = vpop.f32.mrb[23].mxu0  ;;  %v1155_v30 = vpop.f32.mrb[23].mxu1 }
 0x198   : > { %v1076_v37 = vadd.f32 %v1075_v29, %v4829_v12  ;;  %v1156_v38 = vadd.f32 %v1155_v30, %v4829_v12 }
 0x199   : > { %v3448_v39 = vpack.c.bf16 %v1074_v27, %v1070_v25  ;;  %v3488_v15 = vpack.c.bf16 %v1154_v28, %v1150_v26  ;;  %v4945_v25 = vrot.slane %v4822_v46, %v489_v59 }
 0x19a   : > { %v3688_v45 = vpack.c.bf16 %v1076_v37, %v1072_v33  ;;  %v3728_v56 = vpack.c.bf16 %v1156_v38, %v1152_v36 }
 0x19b   : > { %3904 = vst [vmem:[%s4843_s6 + $0x28] sm:$0xff] %v3448_v39   ;;  %3912 = vst [vmem:[%s4843_s6 + $0x68] sm:$0xff] %v3488_v15  }
 0x19c   : > { %3950 = vst [vmem:[%s4843_s6 + $0xa8] sm:$0xff] %v3688_v45   ;;  %3958 = vst [vmem:[%s4843_s6 + $0xe8] sm:$0xff] %v3728_v56   ;;  %v1079_v1 = vpop.f32.mrb[24].mxu0  ;;  %v1159_v2 = vpop.f32.mrb[24].mxu1 }
 0x19d   : > { %v1081_v13 = vpop.f32.mrb[25].mxu0  ;;  %v1161_v23 = vpop.f32.mrb[25].mxu1  ;;  %v1080_v35 = vadd.f32 %v1079_v1, %v4826_v57  ;;  %v1160_v43 = vadd.f32 %v1159_v2, %v4826_v57 }
 0x19e   : > { %v1083_v24 = vpop.f32.mrb[26].mxu0  ;;  %v1163_v34 = vpop.f32.mrb[26].mxu1  ;;  %v1082_v6 = vadd.f32 %v1081_v13, %v4829_v12  ;;  %v1162_v17 = vadd.f32 %v1161_v23, %v4829_v12 }
 0x19f   : > { %v1084_v44 = vadd.f32 %v1083_v24, %v4826_v57  ;;  %v1164_v54 = vadd.f32 %v1163_v34, %v4826_v57  ;;  %v1085_v55 = vpop.f32.mrb[27].mxu0  ;;  %v1165_v5 = vpop.f32.mrb[27].mxu1 }
 0x1a0   : > { %v1086_v18 = vadd.f32 %v1085_v55, %v4829_v12  ;;  %v1166_v31 = vadd.f32 %v1165_v5, %v4829_v12 }
 0x1a1   : > { %v3453_v32 = vpack.c.bf16 %v1084_v44, %v1080_v35  ;;  %v3493_v40 = vpack.c.bf16 %v1164_v54, %v1160_v43 }
 0x1a2   : > { %v3693_v41 = vpack.c.bf16 %v1086_v18, %v1082_v6  ;;  %v3733_v42 = vpack.c.bf16 %v1166_v31, %v1162_v17 }
 0x1a3   : > { %3905 = vst [vmem:[%s4843_s6 + $0x30] sm:$0xff] %v3453_v32   ;;  %3913 = vst [vmem:[%s4843_s6 + $0x70] sm:$0xff] %v3493_v40  }
 0x1a4   : > { %3951 = vst [vmem:[%s4843_s6 + $0xb0] sm:$0xff] %v3693_v41   ;;  %3959 = vst [vmem:[%s4843_s6 + $0xf0] sm:$0xff] %v3733_v42   ;;  %v1089_v47 = vpop.f32.mrb[28].mxu0  ;;  %v1169_v48 = vpop.f32.mrb[28].mxu1 }
 0x1a5   : > { %v1091_v49 = vpop.f32.mrb[29].mxu0  ;;  %v1171_v50 = vpop.f32.mrb[29].mxu1  ;;  %v1090_v61 = vadd.f32 %v1089_v47, %v4826_v57  ;;  %v1170_v62 = vadd.f32 %v1169_v48, %v4826_v57 }
 0x1a6   : > { %v1093_v51 = vpop.f32.mrb[30].mxu0  ;;  %v1173_v52 = vpop.f32.mrb[30].mxu1  ;;  %v1092_v7 = vadd.f32 %v1091_v49, %v4829_v12  ;;  %v1172_v8 = vadd.f32 %v1171_v50, %v4829_v12 }
 0x1a7   : > { %v1094_v63 = vadd.f32 %v1093_v51, %v4826_v57  ;;  %v1174_v0 = vadd.f32 %v1173_v52, %v4826_v57  ;;  %v1095_v3 = vpop.f32.mrb[31].mxu0  ;;  %v1175_v4 = vpop.f32.mrb[31].mxu1  ;;  %v4936_v57 = vrot.slane %v4822_v46, %v485_v53 }
 0x1a8   : > { %v1096_v19 = vadd.f32 %v1095_v3, %v4829_v12  ;;  %v1176_v9 = vadd.f32 %v1175_v4, %v4829_v12  ;;  %v4948_v12 = vrot.slane %v4822_v46, %v497_v60 }
 0x1a9   : > { %v3458_v10 = vpack.c.bf16 %v1094_v63, %v1090_v61  ;;  %v3498_v11 = vpack.c.bf16 %v1174_v0, %v1170_v62 }
 0x1aa   : > { %v3698_v14 = vpack.c.bf16 %v1096_v19, %v1092_v7  ;;  %v3738_v16 = vpack.c.bf16 %v1176_v9, %v1172_v8 }
 0x1ab   : > { %3906 = vst [vmem:[%s4843_s6 + $0x38] sm:$0xff] %v3458_v10   ;;  %3914 = vst [vmem:[%s4843_s6 + $0x78] sm:$0xff] %v3498_v11  }
 0x1ac   : > { %3952 = vst [vmem:[%s4843_s6 + $0xb8] sm:$0xff] %v3698_v14   ;;  %3960 = vst [vmem:[%s4843_s6 + $0xf8] sm:$0xff] %v3738_v16   ;;  %v1212_v21 = vpop.f32.mrb[32].mxu1  ;;  %v1405_v22 = vpop.f32.mrb[32].mxu0 }
 0x1ad   : > { %v1214_v26 = vpop.f32.mrb[33].mxu1  ;;  %v1407_v27 = vpop.f32.mrb[33].mxu0  ;;  %v1213_v30 = vadd.f32 %v1212_v21, %v4936_v57  ;;  %v1406_v33 = vadd.f32 %v1405_v22, %v4939_v20 }
 0x1ae   : > { %v1216_v28 = vpop.f32.mrb[34].mxu1  ;;  %v1409_v29 = vpop.f32.mrb[34].mxu0  ;;  %v1215_v15 = vadd.f32 %v1214_v26, %v4945_v25  ;;  %v1408_v46 = vadd.f32 %v1407_v27, %v4948_v12 }
 0x1af   : > { %v1217_v36 = vadd.f32 %v1216_v28, %v4936_v57  ;;  %v1410_v37 = vadd.f32 %v1409_v29, %v4939_v20  ;;  %v1218_v38 = vpop.f32.mrb[35].mxu1  ;;  %v1411_v39 = vpop.f32.mrb[35].mxu0 }
 0x1b0   : > { %v1219_v45 = vadd.f32 %v1218_v38, %v4945_v25  ;;  %v1412_v56 = vadd.f32 %v1411_v39, %v4948_v12 }
 0x1b1   : > { %v3503_v1 = vpack.c.bf16 %v1217_v36, %v1213_v30  ;;  %v3583_v2 = vpack.c.bf16 %v1410_v37, %v1406_v33 }
 0x1b2   : > { %v3743_v13 = vpack.c.bf16 %v1219_v45, %v1215_v15  ;;  %v3823_v23 = vpack.c.bf16 %v1412_v56, %v1408_v46 }
 0x1b3   : > { %3504 = vst [vmem:[%s4959_s16] sm:$0xff] %v3503_v1   ;;  %3584 = vst [vmem:[%s4963_s14] sm:$0xff] %v3583_v2  }
 0x1b4   : > { %3961 = vst [vmem:[%s4959_s16 + $0x80] sm:$0xff] %v3743_v13   ;;  %3977 = vst [vmem:[%s4963_s14 + $0x80] sm:$0xff] %v3823_v23   ;;  %v1222_v24 = vpop.f32.mrb[36].mxu1  ;;  %v1415_v34 = vpop.f32.mrb[36].mxu0 }
 0x1b5   : > { %v1224_v35 = vpop.f32.mrb[37].mxu1  ;;  %v1417_v43 = vpop.f32.mrb[37].mxu0  ;;  %v1223_v55 = vadd.f32 %v1222_v24, %v4936_v57  ;;  %v1416_v5 = vadd.f32 %v1415_v34, %v4939_v20 }
 0x1b6   : > { %v1226_v44 = vpop.f32.mrb[38].mxu1  ;;  %v1419_v54 = vpop.f32.mrb[38].mxu0  ;;  %v1225_v32 = vadd.f32 %v1224_v35, %v4945_v25  ;;  %v1418_v40 = vadd.f32 %v1417_v43, %v4948_v12 }
 0x1b7   : > { %v1227_v6 = vadd.f32 %v1226_v44, %v4936_v57  ;;  %v1420_v17 = vadd.f32 %v1419_v54, %v4939_v20  ;;  %v1228_v18 = vpop.f32.mrb[39].mxu1  ;;  %v1421_v31 = vpop.f32.mrb[39].mxu0 }
 0x1b8   : > { %v1229_v41 = vadd.f32 %v1228_v18, %v4945_v25  ;;  %v1422_v42 = vadd.f32 %v1421_v31, %v4948_v12 }
 0x1b9   : > { %v3508_v47 = vpack.c.bf16 %v1227_v6, %v1223_v55  ;;  %v3588_v48 = vpack.c.bf16 %v1420_v17, %v1416_v5 }
 0x1ba   : > { %v3748_v49 = vpack.c.bf16 %v1229_v41, %v1225_v32  ;;  %v3828_v50 = vpack.c.bf16 %v1422_v42, %v1418_v40 }
 0x1bb   : > { %3915 = vst [vmem:[%s4959_s16 + $0x8] sm:$0xff] %v3508_v47   ;;  %3930 = vst [vmem:[%s4963_s14 + $0x8] sm:$0xff] %v3588_v48  }
 0x1bc   : > { %3962 = vst [vmem:[%s4959_s16 + $0x88] sm:$0xff] %v3748_v49   ;;  %3978 = vst [vmem:[%s4963_s14 + $0x88] sm:$0xff] %v3828_v50   ;;  %v1232_v51 = vpop.f32.mrb[40].mxu1  ;;  %v1425_v52 = vpop.f32.mrb[40].mxu0 }
 0x1bd   : > { %v1234_v53 = vpop.f32.mrb[41].mxu1  ;;  %v1427_v58 = vpop.f32.mrb[41].mxu0  ;;  %v1233_v61 = vadd.f32 %v1232_v51, %v4936_v57  ;;  %v1426_v62 = vadd.f32 %v1425_v52, %v4939_v20 }
 0x1be   : > { %v1236_v59 = vpop.f32.mrb[42].mxu1  ;;  %v1429_v60 = vpop.f32.mrb[42].mxu0  ;;  %v1235_v7 = vadd.f32 %v1234_v53, %v4945_v25  ;;  %v1428_v8 = vadd.f32 %v1427_v58, %v4948_v12 }
 0x1bf   : > { %v1237_v63 = vadd.f32 %v1236_v59, %v4936_v57  ;;  %v1430_v0 = vadd.f32 %v1429_v60, %v4939_v20  ;;  %v1238_v3 = vpop.f32.mrb[43].mxu1  ;;  %v1431_v4 = vpop.f32.mrb[43].mxu0 }
 0x1c0   : > { %v1239_v19 = vadd.f32 %v1238_v3, %v4945_v25  ;;  %v1432_v9 = vadd.f32 %v1431_v4, %v4948_v12 }
 0x1c1   : > { %v3513_v10 = vpack.c.bf16 %v1237_v63, %v1233_v61  ;;  %v3593_v11 = vpack.c.bf16 %v1430_v0, %v1426_v62 }
 0x1c2   : > { %v3753_v14 = vpack.c.bf16 %v1239_v19, %v1235_v7  ;;  %v3833_v16 = vpack.c.bf16 %v1432_v9, %v1428_v8 }
 0x1c3   : > { %3916 = vst [vmem:[%s4959_s16 + $0x10] sm:$0xff] %v3513_v10   ;;  %3931 = vst [vmem:[%s4963_s14 + $0x10] sm:$0xff] %v3593_v11  }
 0x1c4   : > { %3963 = vst [vmem:[%s4959_s16 + $0x90] sm:$0xff] %v3753_v14   ;;  %3979 = vst [vmem:[%s4963_s14 + $0x90] sm:$0xff] %v3833_v16   ;;  %v1242_v21 = vpop.f32.mrb[44].mxu1  ;;  %v1435_v22 = vpop.f32.mrb[44].mxu0 }
 0x1c5   : > { %v1244_v26 = vpop.f32.mrb[45].mxu1  ;;  %v1437_v27 = vpop.f32.mrb[45].mxu0  ;;  %v1243_v30 = vadd.f32 %v1242_v21, %v4936_v57  ;;  %v1436_v33 = vadd.f32 %v1435_v22, %v4939_v20 }
 0x1c6   : > { %v1246_v28 = vpop.f32.mrb[46].mxu1  ;;  %v1439_v29 = vpop.f32.mrb[46].mxu0  ;;  %v1245_v15 = vadd.f32 %v1244_v26, %v4945_v25  ;;  %v1438_v46 = vadd.f32 %v1437_v27, %v4948_v12 }
 0x1c7   : > { %v1247_v36 = vadd.f32 %v1246_v28, %v4936_v57  ;;  %v1440_v37 = vadd.f32 %v1439_v29, %v4939_v20  ;;  %v1248_v38 = vpop.f32.mrb[47].mxu1  ;;  %v1441_v39 = vpop.f32.mrb[47].mxu0 }
 0x1c8   : > { %v1249_v45 = vadd.f32 %v1248_v38, %v4945_v25  ;;  %v1442_v56 = vadd.f32 %v1441_v39, %v4948_v12 }
 0x1c9   : > { %v3518_v1 = vpack.c.bf16 %v1247_v36, %v1243_v30  ;;  %v3598_v2 = vpack.c.bf16 %v1440_v37, %v1436_v33 }
 0x1ca   : > { %v3758_v13 = vpack.c.bf16 %v1249_v45, %v1245_v15  ;;  %v3838_v23 = vpack.c.bf16 %v1442_v56, %v1438_v46 }
 0x1cb   : > { %3917 = vst [vmem:[%s4959_s16 + $0x18] sm:$0xff] %v3518_v1   ;;  %3932 = vst [vmem:[%s4963_s14 + $0x18] sm:$0xff] %v3598_v2  }
 0x1cc   : > { %3964 = vst [vmem:[%s4959_s16 + $0x98] sm:$0xff] %v3758_v13   ;;  %3980 = vst [vmem:[%s4963_s14 + $0x98] sm:$0xff] %v3838_v23   ;;  %v1252_v24 = vpop.f32.mrb[48].mxu1  ;;  %v1445_v34 = vpop.f32.mrb[48].mxu0 }
 0x1cd   : > { %v1254_v35 = vpop.f32.mrb[49].mxu1  ;;  %v1447_v43 = vpop.f32.mrb[49].mxu0  ;;  %v1253_v55 = vadd.f32 %v1252_v24, %v4936_v57  ;;  %v1446_v5 = vadd.f32 %v1445_v34, %v4939_v20 }
 0x1ce   : > { %v1256_v44 = vpop.f32.mrb[50].mxu1  ;;  %v1449_v54 = vpop.f32.mrb[50].mxu0  ;;  %v1255_v32 = vadd.f32 %v1254_v35, %v4945_v25  ;;  %v1448_v40 = vadd.f32 %v1447_v43, %v4948_v12 }
 0x1cf   : > { %v1257_v6 = vadd.f32 %v1256_v44, %v4936_v57  ;;  %v1450_v17 = vadd.f32 %v1449_v54, %v4939_v20  ;;  %v1258_v18 = vpop.f32.mrb[51].mxu1  ;;  %v1451_v31 = vpop.f32.mrb[51].mxu0 }
 0x1d0   : > { %v1259_v41 = vadd.f32 %v1258_v18, %v4945_v25  ;;  %v1452_v42 = vadd.f32 %v1451_v31, %v4948_v12 }
 0x1d1   : > { %v3523_v47 = vpack.c.bf16 %v1257_v6, %v1253_v55  ;;  %v3603_v48 = vpack.c.bf16 %v1450_v17, %v1446_v5 }
 0x1d2   : > { %v3763_v49 = vpack.c.bf16 %v1259_v41, %v1255_v32  ;;  %v3843_v50 = vpack.c.bf16 %v1452_v42, %v1448_v40 }
 0x1d3   : > { %3918 = vst [vmem:[%s4959_s16 + $0x20] sm:$0xff] %v3523_v47   ;;  %3933 = vst [vmem:[%s4963_s14 + $0x20] sm:$0xff] %v3603_v48  }
 0x1d4   : > { %3965 = vst [vmem:[%s4959_s16 + $0xa0] sm:$0xff] %v3763_v49   ;;  %3981 = vst [vmem:[%s4963_s14 + $0xa0] sm:$0xff] %v3843_v50   ;;  %v1262_v51 = vpop.f32.mrb[52].mxu1  ;;  %v1455_v52 = vpop.f32.mrb[52].mxu0 }
 0x1d5   : > { %v1264_v53 = vpop.f32.mrb[53].mxu1  ;;  %v1457_v58 = vpop.f32.mrb[53].mxu0  ;;  %v1263_v61 = vadd.f32 %v1262_v51, %v4936_v57  ;;  %v1456_v62 = vadd.f32 %v1455_v52, %v4939_v20 }
 0x1d6   : > { %v1266_v59 = vpop.f32.mrb[54].mxu1  ;;  %v1459_v60 = vpop.f32.mrb[54].mxu0  ;;  %v1265_v7 = vadd.f32 %v1264_v53, %v4945_v25  ;;  %v1458_v8 = vadd.f32 %v1457_v58, %v4948_v12 }
 0x1d7   : > { %v1267_v63 = vadd.f32 %v1266_v59, %v4936_v57  ;;  %v1460_v0 = vadd.f32 %v1459_v60, %v4939_v20  ;;  %v1268_v3 = vpop.f32.mrb[55].mxu1  ;;  %v1461_v4 = vpop.f32.mrb[55].mxu0 }
 0x1d8   : > { %v1269_v19 = vadd.f32 %v1268_v3, %v4945_v25  ;;  %v1462_v9 = vadd.f32 %v1461_v4, %v4948_v12 }
 0x1d9   : > { %v3528_v10 = vpack.c.bf16 %v1267_v63, %v1263_v61  ;;  %v3608_v11 = vpack.c.bf16 %v1460_v0, %v1456_v62 }
 0x1da   : > { %v3768_v14 = vpack.c.bf16 %v1269_v19, %v1265_v7  ;;  %v3848_v16 = vpack.c.bf16 %v1462_v9, %v1458_v8 }
 0x1db   : > { %3919 = vst [vmem:[%s4959_s16 + $0x28] sm:$0xff] %v3528_v10   ;;  %3934 = vst [vmem:[%s4963_s14 + $0x28] sm:$0xff] %v3608_v11  }
 0x1dc   : > { %3966 = vst [vmem:[%s4959_s16 + $0xa8] sm:$0xff] %v3768_v14   ;;  %3982 = vst [vmem:[%s4963_s14 + $0xa8] sm:$0xff] %v3848_v16   ;;  %v1272_v21 = vpop.f32.mrb[56].mxu1  ;;  %v1465_v22 = vpop.f32.mrb[56].mxu0 }
 0x1dd   : > { %v1274_v26 = vpop.f32.mrb[57].mxu1  ;;  %v1467_v27 = vpop.f32.mrb[57].mxu0  ;;  %v1273_v30 = vadd.f32 %v1272_v21, %v4936_v57  ;;  %v1466_v33 = vadd.f32 %v1465_v22, %v4939_v20 }
 0x1de   : > { %v1276_v28 = vpop.f32.mrb[58].mxu1  ;;  %v1469_v29 = vpop.f32.mrb[58].mxu0  ;;  %v1275_v15 = vadd.f32 %v1274_v26, %v4945_v25  ;;  %v1468_v46 = vadd.f32 %v1467_v27, %v4948_v12 }
 0x1df   : > { %v1277_v36 = vadd.f32 %v1276_v28, %v4936_v57  ;;  %v1470_v37 = vadd.f32 %v1469_v29, %v4939_v20  ;;  %v1278_v38 = vpop.f32.mrb[59].mxu1  ;;  %v1471_v39 = vpop.f32.mrb[59].mxu0 }
 0x1e0   : > { %v1279_v45 = vadd.f32 %v1278_v38, %v4945_v25  ;;  %v1472_v56 = vadd.f32 %v1471_v39, %v4948_v12 }
 0x1e1   : > { %v3533_v1 = vpack.c.bf16 %v1277_v36, %v1273_v30  ;;  %v3613_v2 = vpack.c.bf16 %v1470_v37, %v1466_v33 }
 0x1e2   : > { %v3773_v13 = vpack.c.bf16 %v1279_v45, %v1275_v15  ;;  %v3853_v23 = vpack.c.bf16 %v1472_v56, %v1468_v46 }
 0x1e3   : > { %3920 = vst [vmem:[%s4959_s16 + $0x30] sm:$0xff] %v3533_v1   ;;  %3935 = vst [vmem:[%s4963_s14 + $0x30] sm:$0xff] %v3613_v2  }
 0x1e4   : > { %3967 = vst [vmem:[%s4959_s16 + $0xb0] sm:$0xff] %v3773_v13   ;;  %3983 = vst [vmem:[%s4963_s14 + $0xb0] sm:$0xff] %v3853_v23   ;;  %v1282_v24 = vpop.f32.mrb[60].mxu1  ;;  %v1475_v34 = vpop.f32.mrb[60].mxu0 }
 0x1e5   : > { %v1284_v35 = vpop.f32.mrb[61].mxu1  ;;  %v1477_v43 = vpop.f32.mrb[61].mxu0  ;;  %v1283_v55 = vadd.f32 %v1282_v24, %v4936_v57  ;;  %v1476_v5 = vadd.f32 %v1475_v34, %v4939_v20 }
 0x1e6   : > { %v1286_v44 = vpop.f32.mrb[62].mxu1  ;;  %v1479_v54 = vpop.f32.mrb[62].mxu0  ;;  %v1285_v32 = vadd.f32 %v1284_v35, %v4945_v25  ;;  %v1478_v40 = vadd.f32 %v1477_v43, %v4948_v12 }
 0x1e7   : > { %v1287_v6 = vadd.f32 %v1286_v44, %v4936_v57  ;;  %v1480_v17 = vadd.f32 %v1479_v54, %v4939_v20  ;;  %v1288_v18 = vpop.f32.mrb[63].mxu1  ;;  %v1481_v31 = vpop.f32.mrb[63].mxu0 }
 0x1e8   : > { %v1289_v41 = vadd.f32 %v1288_v18, %v4945_v25  ;;  %v1482_v42 = vadd.f32 %v1481_v31, %v4948_v12 }
 0x1e9   : > { %v3538_v47 = vpack.c.bf16 %v1287_v6, %v1283_v55  ;;  %v3618_v48 = vpack.c.bf16 %v1480_v17, %v1476_v5 }
 0x1ea   : > { %v3778_v49 = vpack.c.bf16 %v1289_v41, %v1285_v32  ;;  %v3858_v50 = vpack.c.bf16 %v1482_v42, %v1478_v40 }
 0x1eb   : > { %3921 = vst [vmem:[%s4959_s16 + $0x38] sm:$0xff] %v3538_v47   ;;  %3936 = vst [vmem:[%s4963_s14 + $0x38] sm:$0xff] %v3618_v48  }
 0x1ec   : > { %3968 = vst [vmem:[%s4959_s16 + $0xb8] sm:$0xff] %v3778_v49   ;;  %3984 = vst [vmem:[%s4963_s14 + $0xb8] sm:$0xff] %v3858_v50   ;;  %v1292_v51 = vpop.f32.mrb[64].mxu1  ;;  %v1485_v52 = vpop.f32.mrb[64].mxu0 }
 0x1ed   : > { %v1294_v53 = vpop.f32.mrb[65].mxu1  ;;  %v1487_v58 = vpop.f32.mrb[65].mxu0  ;;  %v1293_v61 = vadd.f32 %v1292_v51, %v4936_v57  ;;  %v1486_v62 = vadd.f32 %v1485_v52, %v4939_v20 }
 0x1ee   : > { %v1296_v59 = vpop.f32.mrb[66].mxu1  ;;  %v1489_v60 = vpop.f32.mrb[66].mxu0  ;;  %v1295_v7 = vadd.f32 %v1294_v53, %v4945_v25  ;;  %v1488_v8 = vadd.f32 %v1487_v58, %v4948_v12 }
 0x1ef   : > { %v1297_v63 = vadd.f32 %v1296_v59, %v4936_v57  ;;  %v1490_v0 = vadd.f32 %v1489_v60, %v4939_v20  ;;  %v1298_v3 = vpop.f32.mrb[67].mxu1  ;;  %v1491_v4 = vpop.f32.mrb[67].mxu0 }
 0x1f0   : > { %v1299_v19 = vadd.f32 %v1298_v3, %v4945_v25  ;;  %v1492_v9 = vadd.f32 %v1491_v4, %v4948_v12 }
 0x1f1   : > { %v3543_v10 = vpack.c.bf16 %v1297_v63, %v1293_v61  ;;  %v3623_v11 = vpack.c.bf16 %v1490_v0, %v1486_v62 }
 0x1f2   : > { %v3783_v14 = vpack.c.bf16 %v1299_v19, %v1295_v7  ;;  %v3863_v16 = vpack.c.bf16 %v1492_v9, %v1488_v8 }
 0x1f3   : > { %3922 = vst [vmem:[%s4959_s16 + $0x40] sm:$0xff] %v3543_v10   ;;  %3937 = vst [vmem:[%s4963_s14 + $0x40] sm:$0xff] %v3623_v11  }
 0x1f4   : > { %3969 = vst [vmem:[%s4959_s16 + $0xc0] sm:$0xff] %v3783_v14   ;;  %3985 = vst [vmem:[%s4963_s14 + $0xc0] sm:$0xff] %v3863_v16   ;;  %v1302_v21 = vpop.f32.mrb[68].mxu1  ;;  %v1495_v22 = vpop.f32.mrb[68].mxu0 }
 0x1f5   : > { %v1304_v26 = vpop.f32.mrb[69].mxu1  ;;  %v1497_v27 = vpop.f32.mrb[69].mxu0  ;;  %v1303_v30 = vadd.f32 %v1302_v21, %v4936_v57  ;;  %v1496_v33 = vadd.f32 %v1495_v22, %v4939_v20 }
 0x1f6   : > { %v1306_v28 = vpop.f32.mrb[70].mxu1  ;;  %v1499_v29 = vpop.f32.mrb[70].mxu0  ;;  %v1305_v15 = vadd.f32 %v1304_v26, %v4945_v25  ;;  %v1498_v46 = vadd.f32 %v1497_v27, %v4948_v12 }
 0x1f7   : > { %v1307_v36 = vadd.f32 %v1306_v28, %v4936_v57  ;;  %v1500_v37 = vadd.f32 %v1499_v29, %v4939_v20  ;;  %v1308_v38 = vpop.f32.mrb[71].mxu1  ;;  %v1501_v39 = vpop.f32.mrb[71].mxu0 }
 0x1f8   : > { %v1309_v45 = vadd.f32 %v1308_v38, %v4945_v25  ;;  %v1502_v56 = vadd.f32 %v1501_v39, %v4948_v12 }
 0x1f9   : > { %v3548_v1 = vpack.c.bf16 %v1307_v36, %v1303_v30  ;;  %v3628_v2 = vpack.c.bf16 %v1500_v37, %v1496_v33 }
 0x1fa   : > { %v3788_v13 = vpack.c.bf16 %v1309_v45, %v1305_v15  ;;  %v3868_v23 = vpack.c.bf16 %v1502_v56, %v1498_v46 }
 0x1fb   : > { %3923 = vst [vmem:[%s4959_s16 + $0x48] sm:$0xff] %v3548_v1   ;;  %3938 = vst [vmem:[%s4963_s14 + $0x48] sm:$0xff] %v3628_v2  }
 0x1fc   : > { %3970 = vst [vmem:[%s4959_s16 + $0xc8] sm:$0xff] %v3788_v13   ;;  %3986 = vst [vmem:[%s4963_s14 + $0xc8] sm:$0xff] %v3868_v23   ;;  %v1312_v24 = vpop.f32.mrb[72].mxu1  ;;  %v1505_v34 = vpop.f32.mrb[72].mxu0 }
 0x1fd   : > { %v1314_v35 = vpop.f32.mrb[73].mxu1  ;;  %v1507_v43 = vpop.f32.mrb[73].mxu0  ;;  %v1313_v55 = vadd.f32 %v1312_v24, %v4936_v57  ;;  %v1506_v5 = vadd.f32 %v1505_v34, %v4939_v20 }
 0x1fe   : > { %v1316_v44 = vpop.f32.mrb[74].mxu1  ;;  %v1509_v54 = vpop.f32.mrb[74].mxu0  ;;  %v1315_v32 = vadd.f32 %v1314_v35, %v4945_v25  ;;  %v1508_v40 = vadd.f32 %v1507_v43, %v4948_v12 }
 0x1ff   : > { %v1317_v6 = vadd.f32 %v1316_v44, %v4936_v57  ;;  %v1510_v17 = vadd.f32 %v1509_v54, %v4939_v20  ;;  %v1318_v18 = vpop.f32.mrb[75].mxu1  ;;  %v1511_v31 = vpop.f32.mrb[75].mxu0 }
 0x200   : > { %v1319_v41 = vadd.f32 %v1318_v18, %v4945_v25  ;;  %v1512_v42 = vadd.f32 %v1511_v31, %v4948_v12 }
 0x201   : > { %v3553_v47 = vpack.c.bf16 %v1317_v6, %v1313_v55  ;;  %v3633_v48 = vpack.c.bf16 %v1510_v17, %v1506_v5 }
 0x202   : > { %v3793_v49 = vpack.c.bf16 %v1319_v41, %v1315_v32  ;;  %v3873_v50 = vpack.c.bf16 %v1512_v42, %v1508_v40 }
 0x203   : > { %3924 = vst [vmem:[%s4959_s16 + $0x50] sm:$0xff] %v3553_v47   ;;  %3939 = vst [vmem:[%s4963_s14 + $0x50] sm:$0xff] %v3633_v48  }
 0x204   : > { %3971 = vst [vmem:[%s4959_s16 + $0xd0] sm:$0xff] %v3793_v49   ;;  %3987 = vst [vmem:[%s4963_s14 + $0xd0] sm:$0xff] %v3873_v50   ;;  %v1322_v51 = vpop.f32.mrb[76].mxu1  ;;  %v1515_v52 = vpop.f32.mrb[76].mxu0 }
 0x205   : > { %v1324_v53 = vpop.f32.mrb[77].mxu1  ;;  %v1517_v58 = vpop.f32.mrb[77].mxu0  ;;  %v1323_v61 = vadd.f32 %v1322_v51, %v4936_v57  ;;  %v1516_v62 = vadd.f32 %v1515_v52, %v4939_v20 }
 0x206   : > { %v1326_v59 = vpop.f32.mrb[78].mxu1  ;;  %v1519_v60 = vpop.f32.mrb[78].mxu0  ;;  %v1325_v7 = vadd.f32 %v1324_v53, %v4945_v25  ;;  %v1518_v8 = vadd.f32 %v1517_v58, %v4948_v12 }
 0x207   : > { %v1327_v63 = vadd.f32 %v1326_v59, %v4936_v57  ;;  %v1520_v0 = vadd.f32 %v1519_v60, %v4939_v20  ;;  %v1328_v3 = vpop.f32.mrb[79].mxu1  ;;  %v1521_v4 = vpop.f32.mrb[79].mxu0 }
 0x208   : > { %v1329_v19 = vadd.f32 %v1328_v3, %v4945_v25  ;;  %v1522_v9 = vadd.f32 %v1521_v4, %v4948_v12 }
 0x209   : > { %v3558_v10 = vpack.c.bf16 %v1327_v63, %v1323_v61  ;;  %v3638_v11 = vpack.c.bf16 %v1520_v0, %v1516_v62 }
 0x20a   : > { %v3798_v14 = vpack.c.bf16 %v1329_v19, %v1325_v7  ;;  %v3878_v16 = vpack.c.bf16 %v1522_v9, %v1518_v8 }
 0x20b   : > { %3925 = vst [vmem:[%s4959_s16 + $0x58] sm:$0xff] %v3558_v10   ;;  %3940 = vst [vmem:[%s4963_s14 + $0x58] sm:$0xff] %v3638_v11  }
 0x20c   : > { %3972 = vst [vmem:[%s4959_s16 + $0xd8] sm:$0xff] %v3798_v14   ;;  %3988 = vst [vmem:[%s4963_s14 + $0xd8] sm:$0xff] %v3878_v16   ;;  %v1332_v21 = vpop.f32.mrb[80].mxu1  ;;  %v1525_v22 = vpop.f32.mrb[80].mxu0 }
 0x20d   : > { %v1334_v26 = vpop.f32.mrb[81].mxu1  ;;  %v1527_v27 = vpop.f32.mrb[81].mxu0  ;;  %v1333_v30 = vadd.f32 %v1332_v21, %v4936_v57  ;;  %v1526_v33 = vadd.f32 %v1525_v22, %v4939_v20 }
 0x20e   : > { %v1336_v28 = vpop.f32.mrb[82].mxu1  ;;  %v1529_v29 = vpop.f32.mrb[82].mxu0  ;;  %v1335_v15 = vadd.f32 %v1334_v26, %v4945_v25  ;;  %v1528_v46 = vadd.f32 %v1527_v27, %v4948_v12 }
 0x20f   : > { %v1337_v36 = vadd.f32 %v1336_v28, %v4936_v57  ;;  %v1530_v37 = vadd.f32 %v1529_v29, %v4939_v20  ;;  %v1338_v38 = vpop.f32.mrb[83].mxu1  ;;  %v1531_v39 = vpop.f32.mrb[83].mxu0 }
 0x210   : > { %v1339_v45 = vadd.f32 %v1338_v38, %v4945_v25  ;;  %v1532_v56 = vadd.f32 %v1531_v39, %v4948_v12 }
 0x211   : > { %v3563_v1 = vpack.c.bf16 %v1337_v36, %v1333_v30  ;;  %v3643_v2 = vpack.c.bf16 %v1530_v37, %v1526_v33 }
 0x212   : > { %v3803_v13 = vpack.c.bf16 %v1339_v45, %v1335_v15  ;;  %v3883_v23 = vpack.c.bf16 %v1532_v56, %v1528_v46 }
 0x213   : > { %3926 = vst [vmem:[%s4959_s16 + $0x60] sm:$0xff] %v3563_v1   ;;  %3941 = vst [vmem:[%s4963_s14 + $0x60] sm:$0xff] %v3643_v2  }
 0x214   : > { %3973 = vst [vmem:[%s4959_s16 + $0xe0] sm:$0xff] %v3803_v13   ;;  %3989 = vst [vmem:[%s4963_s14 + $0xe0] sm:$0xff] %v3883_v23   ;;  %v1342_v24 = vpop.f32.mrb[84].mxu1  ;;  %v1535_v34 = vpop.f32.mrb[84].mxu0 }
 0x215   : > { %v1344_v35 = vpop.f32.mrb[85].mxu1  ;;  %v1537_v43 = vpop.f32.mrb[85].mxu0  ;;  %v1343_v55 = vadd.f32 %v1342_v24, %v4936_v57  ;;  %v1536_v5 = vadd.f32 %v1535_v34, %v4939_v20 }
 0x216   : > { %v1346_v44 = vpop.f32.mrb[86].mxu1  ;;  %v1539_v54 = vpop.f32.mrb[86].mxu0  ;;  %v1345_v32 = vadd.f32 %v1344_v35, %v4945_v25  ;;  %v1538_v40 = vadd.f32 %v1537_v43, %v4948_v12 }
 0x217   : > { %v1347_v6 = vadd.f32 %v1346_v44, %v4936_v57  ;;  %v1540_v17 = vadd.f32 %v1539_v54, %v4939_v20  ;;  %v1348_v18 = vpop.f32.mrb[87].mxu1  ;;  %v1541_v31 = vpop.f32.mrb[87].mxu0 }
 0x218   : > { %v1349_v41 = vadd.f32 %v1348_v18, %v4945_v25  ;;  %v1542_v42 = vadd.f32 %v1541_v31, %v4948_v12 }
 0x219   : > { %v3568_v47 = vpack.c.bf16 %v1347_v6, %v1343_v55  ;;  %v3648_v48 = vpack.c.bf16 %v1540_v17, %v1536_v5 }
 0x21a   : > { %v3808_v49 = vpack.c.bf16 %v1349_v41, %v1345_v32  ;;  %v3888_v50 = vpack.c.bf16 %v1542_v42, %v1538_v40 }
 0x21b   : > { %3927 = vst [vmem:[%s4959_s16 + $0x68] sm:$0xff] %v3568_v47   ;;  %3942 = vst [vmem:[%s4963_s14 + $0x68] sm:$0xff] %v3648_v48  }
 0x21c   : > { %3974 = vst [vmem:[%s4959_s16 + $0xe8] sm:$0xff] %v3808_v49   ;;  %3990 = vst [vmem:[%s4963_s14 + $0xe8] sm:$0xff] %v3888_v50   ;;  %v1352_v51 = vpop.f32.mrb[88].mxu1  ;;  %v1545_v52 = vpop.f32.mrb[88].mxu0 }
 0x21d   : > { %v1354_v53 = vpop.f32.mrb[89].mxu1  ;;  %v1547_v58 = vpop.f32.mrb[89].mxu0  ;;  %v1353_v61 = vadd.f32 %v1352_v51, %v4936_v57  ;;  %v1546_v62 = vadd.f32 %v1545_v52, %v4939_v20 }
 0x21e   : > { %v1356_v59 = vpop.f32.mrb[90].mxu1  ;;  %v1549_v60 = vpop.f32.mrb[90].mxu0  ;;  %v1355_v7 = vadd.f32 %v1354_v53, %v4945_v25  ;;  %v1548_v8 = vadd.f32 %v1547_v58, %v4948_v12 }
 0x21f   : > { %v1357_v63 = vadd.f32 %v1356_v59, %v4936_v57  ;;  %v1550_v0 = vadd.f32 %v1549_v60, %v4939_v20  ;;  %v1358_v3 = vpop.f32.mrb[91].mxu1  ;;  %v1551_v4 = vpop.f32.mrb[91].mxu0 }
 0x220   : > { %v1359_v19 = vadd.f32 %v1358_v3, %v4945_v25  ;;  %v1552_v9 = vadd.f32 %v1551_v4, %v4948_v12 }
 0x221   : > { %v3573_v10 = vpack.c.bf16 %v1357_v63, %v1353_v61  ;;  %v3653_v11 = vpack.c.bf16 %v1550_v0, %v1546_v62 }
 0x222   : > { %v3813_v14 = vpack.c.bf16 %v1359_v19, %v1355_v7  ;;  %v3893_v16 = vpack.c.bf16 %v1552_v9, %v1548_v8 }
 0x223   : > { %3928 = vst [vmem:[%s4959_s16 + $0x70] sm:$0xff] %v3573_v10   ;;  %3943 = vst [vmem:[%s4963_s14 + $0x70] sm:$0xff] %v3653_v11  }
 0x224   : > { %3975 = vst [vmem:[%s4959_s16 + $0xf0] sm:$0xff] %v3813_v14   ;;  %3991 = vst [vmem:[%s4963_s14 + $0xf0] sm:$0xff] %v3893_v16   ;;  %v1362_v21 = vpop.f32.mrb[92].mxu1  ;;  %v1555_v22 = vpop.f32.mrb[92].mxu0 }
 0x225   : > { %v1364_v26 = vpop.f32.mrb[93].mxu1  ;;  %v1557_v27 = vpop.f32.mrb[93].mxu0  ;;  %v1363_v30 = vadd.f32 %v1362_v21, %v4936_v57  ;;  %v1556_v33 = vadd.f32 %v1555_v22, %v4939_v20 }
 0x226   : > { %v1366_v28 = vpop.f32.mrb[94].mxu1  ;;  %v1559_v29 = vpop.f32.mrb[94].mxu0  ;;  %v1365_v15 = vadd.f32 %v1364_v26, %v4945_v25  ;;  %v1558_v46 = vadd.f32 %v1557_v27, %v4948_v12 }
 0x227   : > { %v1367_v36 = vadd.f32 %v1366_v28, %v4936_v57  ;;  %v1560_v37 = vadd.f32 %v1559_v29, %v4939_v20  ;;  %v1368_v38 = vpop.f32.mrb[95].mxu1  ;;  %v1561_v39 = vpop.f32.mrb[95].mxu0 }
 0x228   : > { %v1369_v45 = vadd.f32 %v1368_v38, %v4945_v25  ;;  %v1562_v56 = vadd.f32 %v1561_v39, %v4948_v12 }
 0x229   : > { %v3578_v1 = vpack.c.bf16 %v1367_v36, %v1363_v30  ;;  %v3658_v2 = vpack.c.bf16 %v1560_v37, %v1556_v33 }
 0x22a   : > { %v3818_v13 = vpack.c.bf16 %v1369_v45, %v1365_v15  ;;  %v3898_v23 = vpack.c.bf16 %v1562_v56, %v1558_v46 }
 0x22b   : > { %3929 = vst [vmem:[%s4959_s16 + $0x78] sm:$0xff] %v3578_v1   ;;  %3944 = vst [vmem:[%s4963_s14 + $0x78] sm:$0xff] %v3658_v2  }
 0x22c   : > { %3976 = vst [vmem:[%s4959_s16 + $0xf8] sm:$0xff] %v3818_v13   ;;  %3992 = vst [vmem:[%s4963_s14 + $0xf8] sm:$0xff] %v3898_v23  }
 0x22d   : > { %s5154_s17 = sshll.u32 %s4463_s22, 11  ;;  %s2567_s8 = sshll.u32 %s4843_s6, 4  ;;  %s2568_s8 = int_to_ptr.vmem [resolvable:$true] %s2567_s8 }
 0x22e   : > { %s2550_s12 = scalar_lea.hbm %s5238_s3, %s5154_s17  ;;  %s4391_s11 = smov 2048  }
 0x22f   : > { %4031 = sst [smem:[#allocation12]] (%p4535_p12), %s4391_s11  ;;  %s4392_s24 = smov 4096  }
 0x230   : > { %4032 = sst [smem:[#allocation12 + $0x1]] (%p4535_p12), %s4392_s24  ;;  %s4393_s26 = smov 32  }
 0x231   : > { %4033 = sst [smem:[#allocation12 + $0x2]] (%p4535_p12), %s4393_s26  ;;  %s4394_s15 = smov 64  }
 0x232   : > { %4034 = sst [smem:[#allocation12 + $0x3]] (%p4535_p12), %s4394_s15  ;;  %s4395_s22 = smov 4  }
 0x233   : > { %4035 = sst [smem:[#allocation12 + $0x4]] (%p4535_p12), %s4394_s15  ;;  %s4396_s6 = smov [#allocation11]  }
 0x234   : > { %4036 = sst [smem:[#allocation12 + $0x5]] (%p4535_p12), %s4395_s22  ;;  %s4397_s7 = smov 0  }
 0x235   : > { %4037 = dma.general (%p4535_p12), %s2568_s8, 4096, %s2550_s12, %s2528_s28, %s4396_s6, [#allocation12], %s4397_s7, 0  }
 0x236   : > { %s2595_s11 = scalar_lea.hbm %s5239_s4, %s5154_s17  ;;  %s2612_s24 = sshll.u32 %s4959_s16, 4  ;;  %s2613_s24 = int_to_ptr.vmem [resolvable:$true] %s2612_s24 }
 0x237   : > { %s4398_s26 = smov 2048   ;;  %s4399_s28 = smov 4096  }
 0x238   : > { %4038 = sst [smem:[#allocation14]] (%p4535_p12), %s4398_s26  ;;  %s4400_s8 = smov 32  }
 0x239   : > { %4039 = sst [smem:[#allocation14 + $0x1]] (%p4535_p12), %s4399_s28  ;;  %s4401_s12 = smov 64  }
 0x23a   : > { %4040 = sst [smem:[#allocation14 + $0x2]] (%p4535_p12), %s4400_s8  ;;  %s4402_s15 = smov 4  }
 0x23b   : > { %4041 = sst [smem:[#allocation14 + $0x3]] (%p4535_p12), %s4401_s12  ;;  %s4403_s22 = smov [#allocation13]  }
 0x23c   : > { %4042 = sst [smem:[#allocation14 + $0x4]] (%p4535_p12), %s4401_s12  ;;  %s4404_s16 = smov 0  }
 0x23d   : > { %4043 = sst [smem:[#allocation14 + $0x5]] (%p4535_p12), %s4402_s15 }
 0x23e   : > { %4044 = dma.general (%p4535_p12), %s2613_s24, 4096, %s2595_s11, %s5151_s27, %s4403_s22, [#allocation14], %s4404_s16, 0  }
 0x23f   : > { %s2640_s13 = scalar_lea.hbm %s5240_s5, %s5154_s17  ;;  %s2657_s29 = sshll.u32 %s4963_s14, 4  ;;  %s2658_s29 = int_to_ptr.vmem [resolvable:$true] %s2657_s29 }
 0x240   : > { %s4405_s26 = smov 2048   ;;  %s4406_s11 = smov 4096  }
 0x241   : > { %4045 = sst [smem:[#allocation16]] (%p4535_p12), %s4405_s26  ;;  %s4407_s24 = smov 32  }
 0x242   : > { %4046 = sst [smem:[#allocation16 + $0x1]] (%p4535_p12), %s4406_s11  ;;  %s4408_s28 = smov 64  }
 0x243   : > { %4047 = sst [smem:[#allocation16 + $0x2]] (%p4535_p12), %s4407_s24  ;;  %s4409_s8 = smov 4  }
 0x244   : > { %4048 = sst [smem:[#allocation16 + $0x3]] (%p4535_p12), %s4408_s28  ;;  %s4410_s17 = smov [#allocation15]  }
 0x245   : > { %4049 = sst [smem:[#allocation16 + $0x4]] (%p4535_p12), %s4408_s28  ;;  %s4411_s14 = smov 0  }
 0x246   : > { %4050 = sst [smem:[#allocation16 + $0x5]] (%p4535_p12), %s4409_s8 }
 0x247   : > { %4051 = dma.general (%p4535_p12), %s2658_s29, 4096, %s2640_s13, %s5151_s27, %s4410_s17, [#allocation16], %s4411_s14, 0  }
 0x248 PF: > { %s2685_s12 = sand.u32 1, %s4371_s18   ;;  %p5255_p4 = scmp.ne.s32.totalorder %s5245_s25, 0 }
 0x249   : > { %p5256_p6 = scmp.ge.s32.totalorder %s4383_s21, 2  ;;  %s2686_s15 = scalar_lea.sflag [#allocation4], %s2685_s12 }
 0x24b   : > { %p4064_p8 = pnand %p5256_p6, %p5255_p4 }
 0x24d   : > { %4362 = dma.done.wait (!%p4064_p8), %s2686_s15, 4096  }
 0x24e   : > { %4364 = vsyncadd (!%p4064_p8), %s2686_s15, 4294963200  ;;  %s2694_s22 = sand.u32 1, %s2814_s23  }
 0x24f   : > { %s2695_s16 = scalar_lea.sflag [#allocation9], %s2694_s22 }
 0x250   : > { %4366 = dma.done.wait (!%p4064_p8), %s2695_s16, 8192  }
 0x251   : > { %4368 = vsyncadd (!%p4064_p8), %s2695_s16, 4294959104  ;;  %p23_p12 = scmp.ge.s32.totalorder %s4500_s30, 4   ;;  %s5257_s18 = smov %s4375_s19 }
 0x252   : > { %s5258_s19 = smov %s4379_s20  ;;  %s5259_s20 = smov %s4531_s9 }
 0x253   : > { %s5260_s21 = smov %s4500_s30  ;;  %25 = sbr.rel (!%p23_p12) target bundleno = 8 (0x8), region = 131 }
 0x25a   :  { %2709 = vsyncpa [#allocation3], 1 }
 0x25b   :  { %2711 = vsyncpa [#allocation3 + $0x1], 1 }
 0x25c   :  { %2712 = vsyncpa [#allocation6], 1 }
 0x25d   :  { %2713 = vsyncpa [#allocation4], 1 }
 0x25e   :  { %2715 = vsyncpa [#allocation4 + $0x1], 1 }
 0x25f   :  { %2716 = vsyncpa [#allocation9], 1 }
 0x260   :  { %2718 = vsyncpa [#allocation9 + $0x1], 1 }

</bundles_post_ra>
